<compile_context>
chip_gen: v6e
topology: v6e:2x2x1
jax: 0.10.0
libtpu: 0.0.40
codegen_flags: <defaults>
</compile_context>

<pallas_src>
import math

import jax
import jax.numpy as jnp
from jax.experimental import pallas as pl
from jax.experimental.pallas import tpu as pltpu


def make_rnn_kernel(n_layers: int, hidden_size: int, seq_len: int,
                    batch_pad: int, input_size: int):
    H, T, Bp, L, D_in = hidden_size, seq_len, batch_pad, n_layers, input_size

    def kernel(*refs):
        x_ref = refs[0]                              # (T, Bp, D_in) bf16
        layer_refs = refs[1:1 + 4 * L]               # per layer: w_ih_T, w_hh_T, b_gi, b_hn
        w_out_ref = refs[1 + 4 * L]                  # (H, O) bf16
        b_out_ref = refs[2 + 4 * L]                  # (1, O) f32
        probs_ref = refs[3 + 4 * L]                  # (Bp, O) f32 output
        hidden_ref = refs[4 + 4 * L]                 # (L, Bp, H) f32 output

        # Hoisted weight/bias loads (once, not per timestep).
        w_ih = [layer_refs[4 * l][...] for l in range(L)]        # (in_dim, 3H) bf16
        w_hh = [layer_refs[4 * l + 1][...] for l in range(L)]    # (H, 3H) bf16
        b_gi = [layer_refs[4 * l + 2][...] for l in range(L)]    # (1, 3H) f32  (b_ih + [b_hh_r, b_hh_z, 0])
        b_hn = [layer_refs[4 * l + 3][...] for l in range(L)]    # (1, H)  f32  (b_hh n-gate part)

        # Layer 0 input projection batched over ALL T timesteps -> one MXU matmul.
        x_in = x_ref[...].reshape(T * Bp, D_in)                  # bf16
        gi0_all = jnp.dot(x_in, w_ih[0],
                          preferred_element_type=jnp.float32) + b_gi[0]   # (T*Bp, 3H) f32

        def gru_cell(gi, gh_raw, b_hn_l, h_prev):
            # gi already contains b_ih + b_hh for the r/z gates; gh_raw is bias-free.
            rz = jax.nn.sigmoid(gi[:, :2 * H] + gh_raw[:, :2 * H])   # r & z in ONE sigmoid
            r = rz[:, :H]
            z = rz[:, H:]
            n = jnp.tanh(gi[:, 2 * H:] + r * (gh_raw[:, 2 * H:] + b_hn_l))
            return n + z * (h_prev - n)              # == (1-z)*n + z*h_prev

        # hidden=None in PyTorch -> zero init (f32 state; cast to bf16 only at dots).
        h = [jnp.zeros((Bp, H), jnp.float32) for _ in range(L)]

        for t in range(T):                           # genuinely sequential part only
            # Recurrent matmuls for ALL layers depend only on step t-1 state:
            # issue them together so the scheduler overlaps L independent chains.
            gh = [jnp.dot(h[l].astype(jnp.bfloat16), w_hh[l],
                          preferred_element_type=jnp.float32) for l in range(L)]

            # Layer 0 uses the pre-projected input (static, sublane-aligned slice).
            h[0] = gru_cell(gi0_all[t * Bp:(t + 1) * Bp], gh[0], b_hn[0], h[0])

            # Layers >= 1: input projection from the fresh hidden of the layer below.
            for l in range(1, L):
                gi_l = jnp.dot(h[l - 1].astype(jnp.bfloat16), w_ih[l],
                               preferred_element_type=jnp.float32) + b_gi[l]
                h[l] = gru_cell(gi_l, gh[l], b_hn[l], h[l])
            # TODO(synk): inter-layer dropout (training mode only) is not applied;
            # this kernel implements inference semantics.

        for l in range(L):
            hidden_ref[l] = h[l]                     # final per-layer state

        # Fused Linear + Softmax on the last layer's final hidden state.
        logits = jnp.dot(h[L - 1].astype(jnp.bfloat16), w_out_ref[...],
                         preferred_element_type=jnp.float32) + b_out_ref[...]
        m = jnp.max(logits, axis=1, keepdims=True)
        e = jnp.exp(logits - m)
        inv = pl.reciprocal(jnp.sum(e, axis=1, keepdims=True), approx=True)
        probs_ref[...] = e * inv                     # softmax(dim=1)

    return kernel


def _pack_params(params, *, hidden_size, n_layers):
    """Fold biases and cast MXU operands to bf16 (wrapper-side, once)."""
    H = hidden_size
    gru_packed = []
    for layer in range(n_layers):
        w_ih_T, w_hh_T, b_ih, b_hh = params["gru"][layer]
        b_gi = b_ih + jnp.concatenate(
            [b_hh[:, :2 * H], jnp.zeros((1, H), jnp.float32)], axis=1)   # (1, 3H)
        b_hn = b_hh[:, 2 * H:]                                           # (1, H)
        gru_packed.append((w_ih_T.astype(jnp.bfloat16),
                           w_hh_T.astype(jnp.bfloat16),
                           b_gi, b_hn))
    w_out = params["w_out_T"].astype(jnp.bfloat16)
    b_out = params["b_out"]
    return gru_packed, w_out, b_out


def rnn_forward(x_btd, params, *, hidden_size, output_size, n_layers):
    """x_btd: (B, T, 64) float32 (batch_first, like PyTorch). Returns (probs, hidden)."""
    B, T, D_in = x_btd.shape
    H, O, L = hidden_size, output_size, n_layers

    # Pad batch to a full sublane group (multiple of 8) so vregs / MXU rows are used.
    Bp = max(8, ((B + 7) // 8) * 8)
    x_pad = jnp.pad(x_btd, ((0, Bp - B), (0, 0), (0, 0)))
    x_tbd = jnp.transpose(x_pad, (1, 0, 2)).astype(jnp.bfloat16)   # (T, Bp, 64) bf16

    gru_packed, w_out, b_out = _pack_params(params, hidden_size=H, n_layers=L)

    # Flat input list: x, then (w_ih_T, w_hh_T, b_gi, b_hn) per layer, then w_out_T, b_out.
    flat_inputs = [x_tbd]
    in_specs = [pl.BlockSpec((T, Bp, D_in), lambda i: (0, 0, 0))]
    for layer in range(L):
        for w in gru_packed[layer]:
            flat_inputs.append(w)
            in_specs.append(pl.BlockSpec(w.shape, lambda i, nd=w.ndim: (0,) * nd))
    for w in (w_out, b_out):
        flat_inputs.append(w)
        in_specs.append(pl.BlockSpec(w.shape, lambda i, nd=w.ndim: (0,) * nd))

    kernel = make_rnn_kernel(L, H, T, Bp, D_in)

    probs, hidden = pl.pallas_call(
        kernel,
        out_shape=(
            jax.ShapeDtypeStruct((Bp, O), jnp.float32),
            jax.ShapeDtypeStruct((L, Bp, H), jnp.float32),
        ),
        grid_spec=pltpu.PrefetchScalarGridSpec(
            num_scalar_prefetch=0,
            grid=(1,),                               # single invocation; time loop is in-kernel
            in_specs=in_specs,
            out_specs=[
                pl.BlockSpec((Bp, O), lambda i: (0, 0)),
                pl.BlockSpec((L, Bp, H), lambda i: (0, 0, 0)),
            ],
            scratch_shapes=[],                       # no inter-layer scratch needed anymore
        ),
        compiler_params=pltpu.CompilerParams(
            dimension_semantics=("arbitrary",),
        ),
    )(*flat_inputs)

    return probs[:B], hidden[:, :B]                  # strip batch padding


def init_params(key, *, input_size, hidden_size, output_size, n_layers):
    """Deterministic PyTorch-style init: U(-1/sqrt(H), 1/sqrt(H)). Stored in f32."""
    H = hidden_size
    a = 1.0 / math.sqrt(H)
    params = {"gru": []}
    for layer in range(n_layers):
        in_dim = input_size if layer == 0 else H
        key, k1, k2, k3, k4 = jax.random.split(key, 5)
        w_ih = jax.random.uniform(k1, (3 * H, in_dim), jnp.float32, -a, a)
        w_hh = jax.random.uniform(k2, (3 * H, H), jnp.float32, -a, a)
        b_ih = jax.random.uniform(k3, (3 * H,), jnp.float32, -a, a)
        b_hh = jax.random.uniform(k4, (3 * H,), jnp.float32, -a, a)
        params["gru"].append(
            (w_ih.T, w_hh.T, b_ih.reshape(1, -1), b_hh.reshape(1, -1))
        )
    key, k5, k6 = jax.random.split(key, 3)
    b = 1.0 / math.sqrt(H)
    w_out = jax.random.uniform(k5, (output_size, H), jnp.float32, -b, b)
    b_out = jax.random.uniform(k6, (output_size,), jnp.float32, -b, b)
    params["w_out_T"] = w_out.T
    params["b_out"] = b_out.reshape(1, -1)
    return params


def reference_forward(x_btd, params, *, hidden_size, n_layers):
    """Pure-JAX f32 GRU reference (PyTorch semantics, eval mode)."""
    B, T, _ = x_btd.shape
    H, L = hidden_size, n_layers
    h = jnp.zeros((L, B, H), jnp.float32)
    layer_in = x_btd
    for layer in range(L):
        w_ih_T, w_hh_T, b_ih, b_hh = params["gru"][layer]
        hs = []
        h_l = h[layer]
        for t in range(T):
            x_t = layer_in[:, t, :]
            gi = x_t @ w_ih_T + b_ih
            gh = h_l @ w_hh_T + b_hh
            r = jax.nn.sigmoid(gi[:, :H] + gh[:, :H])
            z = jax.nn.sigmoid(gi[:, H:2 * H] + gh[:, H:2 * H])
            n = jnp.tanh(gi[:, 2 * H:] + r * gh[:, 2 * H:])
            h_l = (1.0 - z) * n + z * h_l
            hs.append(h_l)
        layer_in = jnp.stack(hs, axis=1)
        h = h.at[layer].set(h_l)
    logits = layer_in[:, -1, :] @ params["w_out_T"] + params["b_out"]
    probs = jax.nn.softmax(logits, axis=1)
    return probs, h


if __name__ == "__main__":
    B, T, D_IN = 2, 8, 64          # GRU input size is fixed to 64 by the module
    HIDDEN, OUTPUT, N_LAYERS = 32, 8, 2
    DROPOUT = 0.1                  # inactive in inference semantics

    key = jax.random.PRNGKey(0)
    key, kx = jax.random.split(key)
    x = jax.random.normal(kx, (B, T, D_IN), jnp.float32)

    params = init_params(key, input_size=D_IN, hidden_size=HIDDEN,
                         output_size=OUTPUT, n_layers=N_LAYERS)

    probs, hidden = rnn_forward(x, params, hidden_size=HIDDEN,
                                output_size=OUTPUT, n_layers=N_LAYERS)
    jax.block_until_ready((probs, hidden))

    ref_probs, ref_hidden = reference_forward(x, params, hidden_size=HIDDEN,
                                              n_layers=N_LAYERS)
    assert probs.shape == (B, OUTPUT) and hidden.shape == (N_LAYERS, B, HIDDEN)
    # bf16 MXU operands -> looser tolerance vs the f32 reference (values are in (-1, 1)).
    assert jnp.allclose(probs, ref_probs, rtol=2e-2, atol=2e-2)
    assert jnp.allclose(hidden, ref_hidden, rtol=2e-2, atol=2e-2)

    print("KERNEL_OK")
</pallas_src>

<mosaic_0001>
module attributes {stable_mosaic.version = 11 : i64} {
  func.func @kernel(%arg0: i32, %arg1: memref<8x8x64xbf16, #tpu.memory_space<vmem>>, %arg2: memref<64x96xbf16, #tpu.memory_space<vmem>>, %arg3: memref<32x96xbf16, #tpu.memory_space<vmem>>, %arg4: memref<1x96xf32, #tpu.memory_space<vmem>>, %arg5: memref<1x32xf32, #tpu.memory_space<vmem>>, %arg6: memref<32x96xbf16, #tpu.memory_space<vmem>>, %arg7: memref<32x96xbf16, #tpu.memory_space<vmem>>, %arg8: memref<1x96xf32, #tpu.memory_space<vmem>>, %arg9: memref<1x32xf32, #tpu.memory_space<vmem>>, %arg10: memref<32x8xbf16, #tpu.memory_space<vmem>>, %arg11: memref<1x8xf32, #tpu.memory_space<vmem>>, %arg12: memref<8x8xf32, #tpu.memory_space<vmem>>, %arg13: memref<2x8x32xf32, #tpu.memory_space<vmem>>) attributes {dimension_semantics = [#tpu.dimension_semantics<arbitrary>], iteration_bounds = array<i64: 1>, scalar_prefetch = 0 : i64, scratch_operands = 0 : i64, tpu.core_type = #tpu.core_type<tc>, window_params = [{pipeline_mode = #tpu.pipeline_mode<synchronous>, transform_indices = @transform_0, window_bounds = array<i64: 8, 8, 64>}, {pipeline_mode = #tpu.pipeline_mode<synchronous>, transform_indices = @transform_1, window_bounds = array<i64: 64, 96>}, {pipeline_mode = #tpu.pipeline_mode<synchronous>, transform_indices = @transform_2, window_bounds = array<i64: 32, 96>}, {pipeline_mode = #tpu.pipeline_mode<synchronous>, transform_indices = @transform_3, window_bounds = array<i64: 1, 96>}, {pipeline_mode = #tpu.pipeline_mode<synchronous>, transform_indices = @transform_4, window_bounds = array<i64: 1, 32>}, {pipeline_mode = #tpu.pipeline_mode<synchronous>, transform_indices = @transform_5, window_bounds = array<i64: 32, 96>}, {pipeline_mode = #tpu.pipeline_mode<synchronous>, transform_indices = @transform_6, window_bounds = array<i64: 32, 96>}, {pipeline_mode = #tpu.pipeline_mode<synchronous>, transform_indices = @transform_7, window_bounds = array<i64: 1, 96>}, {pipeline_mode = #tpu.pipeline_mode<synchronous>, transform_indices = @transform_8, window_bounds = array<i64: 1, 32>}, {pipeline_mode = #tpu.pipeline_mode<synchronous>, transform_indices = @transform_9, window_bounds = array<i64: 32, 8>}, {pipeline_mode = #tpu.pipeline_mode<synchronous>, transform_indices = @transform_10, window_bounds = array<i64: 1, 8>}, {pipeline_mode = #tpu.pipeline_mode<synchronous>, transform_indices = @transform_11, window_bounds = array<i64: 8, 8>}, {pipeline_mode = #tpu.pipeline_mode<synchronous>, transform_indices = @transform_12, window_bounds = array<i64: 2, 8, 32>}]} {
    %c0 = arith.constant 0 : index
    %c0_0 = arith.constant 0 : index
    %0 = vector.load %arg2[%c0, %c0_0] : memref<64x96xbf16, #tpu.memory_space<vmem>>, vector<64x96xbf16>
    %c0_1 = arith.constant 0 : index
    %c0_2 = arith.constant 0 : index
    %1 = vector.load %arg6[%c0_1, %c0_2] : memref<32x96xbf16, #tpu.memory_space<vmem>>, vector<32x96xbf16>
    %c0_3 = arith.constant 0 : index
    %c0_4 = arith.constant 0 : index
    %2 = vector.load %arg3[%c0_3, %c0_4] : memref<32x96xbf16, #tpu.memory_space<vmem>>, vector<32x96xbf16>
    %c0_5 = arith.constant 0 : index
    %c0_6 = arith.constant 0 : index
    %3 = vector.load %arg7[%c0_5, %c0_6] : memref<32x96xbf16, #tpu.memory_space<vmem>>, vector<32x96xbf16>
    %c0_7 = arith.constant 0 : index
    %c0_8 = arith.constant 0 : index
    %4 = vector.load %arg4[%c0_7, %c0_8] : memref<1x96xf32, #tpu.memory_space<vmem>>, vector<1x96xf32>
    %c0_9 = arith.constant 0 : index
    %c0_10 = arith.constant 0 : index
    %5 = vector.load %arg8[%c0_9, %c0_10] : memref<1x96xf32, #tpu.memory_space<vmem>>, vector<1x96xf32>
    %c0_11 = arith.constant 0 : index
    %c0_12 = arith.constant 0 : index
    %6 = vector.load %arg5[%c0_11, %c0_12] : memref<1x32xf32, #tpu.memory_space<vmem>>, vector<1x32xf32>
    %c0_13 = arith.constant 0 : index
    %c0_14 = arith.constant 0 : index
    %7 = vector.load %arg9[%c0_13, %c0_14] : memref<1x32xf32, #tpu.memory_space<vmem>>, vector<1x32xf32>
    %c0_15 = arith.constant 0 : index
    %c0_16 = arith.constant 0 : index
    %c0_17 = arith.constant 0 : index
    %8 = vector.load %arg1[%c0_15, %c0_16, %c0_17] : memref<8x8x64xbf16, #tpu.memory_space<vmem>>, vector<8x8x64xbf16>
    %9 = vector.shape_cast %8 : vector<8x8x64xbf16> to vector<64x64xbf16>
    %cst = arith.constant dense<0.000000e+00> : vector<64x96xf32>
    %10 = tpu.matmul %9, %0, %cst {dimension_numbers = #tpu.dot_dimension_numbers<[1], [0], [0], [1], [0, 0, 1, 1], [], []>} : vector<64x64xbf16>, vector<64x96xbf16>, vector<64x96xf32> -> vector<64x96xf32>
    %11 = vector.broadcast %4 : vector<1x96xf32> to vector<64x96xf32>
    %12 = arith.addf %10, %11 : vector<64x96xf32>
    %cst_18 = arith.constant 0.000000e+00 : f32
    %13 = vector.broadcast %cst_18 : f32 to vector<8x32xf32>
    %cst_19 = arith.constant 0.000000e+00 : f32
    %14 = vector.broadcast %cst_19 : f32 to vector<8x32xf32>
    %15 = arith.truncf %13 : vector<8x32xf32> to vector<8x32xbf16>
    %cst_20 = arith.constant dense<0.000000e+00> : vector<8x96xf32>
    %16 = tpu.matmul %15, %2, %cst_20 {dimension_numbers = #tpu.dot_dimension_numbers<[1], [0], [0], [1], [0, 0, 1, 1], [], []>} : vector<8x32xbf16>, vector<32x96xbf16>, vector<8x96xf32> -> vector<8x96xf32>
    %17 = arith.truncf %14 : vector<8x32xf32> to vector<8x32xbf16>
    %cst_21 = arith.constant dense<0.000000e+00> : vector<8x96xf32>
    %18 = tpu.matmul %17, %3, %cst_21 {dimension_numbers = #tpu.dot_dimension_numbers<[1], [0], [0], [1], [0, 0, 1, 1], [], []>} : vector<8x32xbf16>, vector<32x96xbf16>, vector<8x96xf32> -> vector<8x96xf32>
    %19 = vector.extract_strided_slice %12 {offsets = [0, 0], sizes = [8, 96], strides = [1, 1]} : vector<64x96xf32> to vector<8x96xf32>
    %20 = vector.extract_strided_slice %19 {offsets = [0, 0], sizes = [8, 64], strides = [1, 1]} : vector<8x96xf32> to vector<8x64xf32>
    %21 = vector.extract_strided_slice %16 {offsets = [0, 0], sizes = [8, 64], strides = [1, 1]} : vector<8x96xf32> to vector<8x64xf32>
    %22 = arith.addf %20, %21 : vector<8x64xf32>
    %23 = arith.negf %22 : vector<8x64xf32>
    %24 = math.exp %23 : vector<8x64xf32>
    %cst_22 = arith.constant 1.000000e+00 : f32
    %25 = vector.broadcast %cst_22 : f32 to vector<8x64xf32>
    %26 = arith.addf %25, %24 : vector<8x64xf32>
    %27 = arith.divf %25, %26 : vector<8x64xf32>
    %28 = vector.extract_strided_slice %27 {offsets = [0, 0], sizes = [8, 32], strides = [1, 1]} : vector<8x64xf32> to vector<8x32xf32>
    %29 = vector.extract_strided_slice %27 {offsets = [0, 32], sizes = [8, 32], strides = [1, 1]} : vector<8x64xf32> to vector<8x32xf32>
    %30 = vector.extract_strided_slice %19 {offsets = [0, 64], sizes = [8, 32], strides = [1, 1]} : vector<8x96xf32> to vector<8x32xf32>
    %31 = vector.extract_strided_slice %16 {offsets = [0, 64], sizes = [8, 32], strides = [1, 1]} : vector<8x96xf32> to vector<8x32xf32>
    %32 = vector.broadcast %6 : vector<1x32xf32> to vector<8x32xf32>
    %33 = arith.addf %31, %32 : vector<8x32xf32>
    %34 = arith.mulf %28, %33 : vector<8x32xf32>
    %35 = arith.addf %30, %34 : vector<8x32xf32>
    %36 = math.tanh %35 : vector<8x32xf32>
    %37 = arith.subf %13, %36 : vector<8x32xf32>
    %38 = arith.mulf %29, %37 : vector<8x32xf32>
    %39 = arith.addf %36, %38 : vector<8x32xf32>
    %40 = arith.truncf %39 : vector<8x32xf32> to vector<8x32xbf16>
    %cst_23 = arith.constant dense<0.000000e+00> : vector<8x96xf32>
    %41 = tpu.matmul %40, %1, %cst_23 {dimension_numbers = #tpu.dot_dimension_numbers<[1], [0], [0], [1], [0, 0, 1, 1], [], []>} : vector<8x32xbf16>, vector<32x96xbf16>, vector<8x96xf32> -> vector<8x96xf32>
    %42 = vector.broadcast %5 : vector<1x96xf32> to vector<8x96xf32>
    %43 = arith.addf %41, %42 : vector<8x96xf32>
    %44 = vector.extract_strided_slice %43 {offsets = [0, 0], sizes = [8, 64], strides = [1, 1]} : vector<8x96xf32> to vector<8x64xf32>
    %45 = vector.extract_strided_slice %18 {offsets = [0, 0], sizes = [8, 64], strides = [1, 1]} : vector<8x96xf32> to vector<8x64xf32>
    %46 = arith.addf %44, %45 : vector<8x64xf32>
    %47 = arith.negf %46 : vector<8x64xf32>
    %48 = math.exp %47 : vector<8x64xf32>
    %cst_24 = arith.constant 1.000000e+00 : f32
    %49 = vector.broadcast %cst_24 : f32 to vector<8x64xf32>
    %50 = arith.addf %49, %48 : vector<8x64xf32>
    %51 = arith.divf %49, %50 : vector<8x64xf32>
    %52 = vector.extract_strided_slice %51 {offsets = [0, 0], sizes = [8, 32], strides = [1, 1]} : vector<8x64xf32> to vector<8x32xf32>
    %53 = vector.extract_strided_slice %51 {offsets = [0, 32], sizes = [8, 32], strides = [1, 1]} : vector<8x64xf32> to vector<8x32xf32>
    %54 = vector.extract_strided_slice %43 {offsets = [0, 64], sizes = [8, 32], strides = [1, 1]} : vector<8x96xf32> to vector<8x32xf32>
    %55 = vector.extract_strided_slice %18 {offsets = [0, 64], sizes = [8, 32], strides = [1, 1]} : vector<8x96xf32> to vector<8x32xf32>
    %56 = vector.broadcast %7 : vector<1x32xf32> to vector<8x32xf32>
    %57 = arith.addf %55, %56 : vector<8x32xf32>
    %58 = arith.mulf %52, %57 : vector<8x32xf32>
    %59 = arith.addf %54, %58 : vector<8x32xf32>
    %60 = math.tanh %59 : vector<8x32xf32>
    %61 = arith.subf %14, %60 : vector<8x32xf32>
    %62 = arith.mulf %53, %61 : vector<8x32xf32>
    %63 = arith.addf %60, %62 : vector<8x32xf32>
    %64 = arith.truncf %39 : vector<8x32xf32> to vector<8x32xbf16>
    %cst_25 = arith.constant dense<0.000000e+00> : vector<8x96xf32>
    %65 = tpu.matmul %64, %2, %cst_25 {dimension_numbers = #tpu.dot_dimension_numbers<[1], [0], [0], [1], [0, 0, 1, 1], [], []>} : vector<8x32xbf16>, vector<32x96xbf16>, vector<8x96xf32> -> vector<8x96xf32>
    %66 = arith.truncf %63 : vector<8x32xf32> to vector<8x32xbf16>
    %cst_26 = arith.constant dense<0.000000e+00> : vector<8x96xf32>
    %67 = tpu.matmul %66, %3, %cst_26 {dimension_numbers = #tpu.dot_dimension_numbers<[1], [0], [0], [1], [0, 0, 1, 1], [], []>} : vector<8x32xbf16>, vector<32x96xbf16>, vector<8x96xf32> -> vector<8x96xf32>
    %68 = vector.extract_strided_slice %12 {offsets = [8, 0], sizes = [8, 96], strides = [1, 1]} : vector<64x96xf32> to vector<8x96xf32>
    %69 = vector.extract_strided_slice %68 {offsets = [0, 0], sizes = [8, 64], strides = [1, 1]} : vector<8x96xf32> to vector<8x64xf32>
    %70 = vector.extract_strided_slice %65 {offsets = [0, 0], sizes = [8, 64], strides = [1, 1]} : vector<8x96xf32> to vector<8x64xf32>
    %71 = arith.addf %69, %70 : vector<8x64xf32>
    %72 = arith.negf %71 : vector<8x64xf32>
    %73 = math.exp %72 : vector<8x64xf32>
    %cst_27 = arith.constant 1.000000e+00 : f32
    %74 = vector.broadcast %cst_27 : f32 to vector<8x64xf32>
    %75 = arith.addf %74, %73 : vector<8x64xf32>
    %76 = arith.divf %74, %75 : vector<8x64xf32>
    %77 = vector.extract_strided_slice %76 {offsets = [0, 0], sizes = [8, 32], strides = [1, 1]} : vector<8x64xf32> to vector<8x32xf32>
    %78 = vector.extract_strided_slice %76 {offsets = [0, 32], sizes = [8, 32], strides = [1, 1]} : vector<8x64xf32> to vector<8x32xf32>
    %79 = vector.extract_strided_slice %68 {offsets = [0, 64], sizes = [8, 32], strides = [1, 1]} : vector<8x96xf32> to vector<8x32xf32>
    %80 = vector.extract_strided_slice %65 {offsets = [0, 64], sizes = [8, 32], strides = [1, 1]} : vector<8x96xf32> to vector<8x32xf32>
    %81 = vector.broadcast %6 : vector<1x32xf32> to vector<8x32xf32>
    %82 = arith.addf %80, %81 : vector<8x32xf32>
    %83 = arith.mulf %77, %82 : vector<8x32xf32>
    %84 = arith.addf %79, %83 : vector<8x32xf32>
    %85 = math.tanh %84 : vector<8x32xf32>
    %86 = arith.subf %39, %85 : vector<8x32xf32>
    %87 = arith.mulf %78, %86 : vector<8x32xf32>
    %88 = arith.addf %85, %87 : vector<8x32xf32>
    %89 = arith.truncf %88 : vector<8x32xf32> to vector<8x32xbf16>
    %cst_28 = arith.constant dense<0.000000e+00> : vector<8x96xf32>
    %90 = tpu.matmul %89, %1, %cst_28 {dimension_numbers = #tpu.dot_dimension_numbers<[1], [0], [0], [1], [0, 0, 1, 1], [], []>} : vector<8x32xbf16>, vector<32x96xbf16>, vector<8x96xf32> -> vector<8x96xf32>
    %91 = vector.broadcast %5 : vector<1x96xf32> to vector<8x96xf32>
    %92 = arith.addf %90, %91 : vector<8x96xf32>
    %93 = vector.extract_strided_slice %92 {offsets = [0, 0], sizes = [8, 64], strides = [1, 1]} : vector<8x96xf32> to vector<8x64xf32>
    %94 = vector.extract_strided_slice %67 {offsets = [0, 0], sizes = [8, 64], strides = [1, 1]} : vector<8x96xf32> to vector<8x64xf32>
    %95 = arith.addf %93, %94 : vector<8x64xf32>
    %96 = arith.negf %95 : vector<8x64xf32>
    %97 = math.exp %96 : vector<8x64xf32>
    %cst_29 = arith.constant 1.000000e+00 : f32
    %98 = vector.broadcast %cst_29 : f32 to vector<8x64xf32>
    %99 = arith.addf %98, %97 : vector<8x64xf32>
    %100 = arith.divf %98, %99 : vector<8x64xf32>
    %101 = vector.extract_strided_slice %100 {offsets = [0, 0], sizes = [8, 32], strides = [1, 1]} : vector<8x64xf32> to vector<8x32xf32>
    %102 = vector.extract_strided_slice %100 {offsets = [0, 32], sizes = [8, 32], strides = [1, 1]} : vector<8x64xf32> to vector<8x32xf32>
    %103 = vector.extract_strided_slice %92 {offsets = [0, 64], sizes = [8, 32], strides = [1, 1]} : vector<8x96xf32> to vector<8x32xf32>
    %104 = vector.extract_strided_slice %67 {offsets = [0, 64], sizes = [8, 32], strides = [1, 1]} : vector<8x96xf32> to vector<8x32xf32>
    %105 = vector.broadcast %7 : vector<1x32xf32> to vector<8x32xf32>
    %106 = arith.addf %104, %105 : vector<8x32xf32>
    %107 = arith.mulf %101, %106 : vector<8x32xf32>
    %108 = arith.addf %103, %107 : vector<8x32xf32>
    %109 = math.tanh %108 : vector<8x32xf32>
    %110 = arith.subf %63, %109 : vector<8x32xf32>
    %111 = arith.mulf %102, %110 : vector<8x32xf32>
    %112 = arith.addf %109, %111 : vector<8x32xf32>
    %113 = arith.truncf %88 : vector<8x32xf32> to vector<8x32xbf16>
    %cst_30 = arith.constant dense<0.000000e+00> : vector<8x96xf32>
    %114 = tpu.matmul %113, %2, %cst_30 {dimension_numbers = #tpu.dot_dimension_numbers<[1], [0], [0], [1], [0, 0, 1, 1], [], []>} : vector<8x32xbf16>, vector<32x96xbf16>, vector<8x96xf32> -> vector<8x96xf32>
    %115 = arith.truncf %112 : vector<8x32xf32> to vector<8x32xbf16>
    %cst_31 = arith.constant dense<0.000000e+00> : vector<8x96xf32>
    %116 = tpu.matmul %115, %3, %cst_31 {dimension_numbers = #tpu.dot_dimension_numbers<[1], [0], [0], [1], [0, 0, 1, 1], [], []>} : vector<8x32xbf16>, vector<32x96xbf16>, vector<8x96xf32> -> vector<8x96xf32>
    %117 = vector.extract_strided_slice %12 {offsets = [16, 0], sizes = [8, 96], strides = [1, 1]} : vector<64x96xf32> to vector<8x96xf32>
    %118 = vector.extract_strided_slice %117 {offsets = [0, 0], sizes = [8, 64], strides = [1, 1]} : vector<8x96xf32> to vector<8x64xf32>
    %119 = vector.extract_strided_slice %114 {offsets = [0, 0], sizes = [8, 64], strides = [1, 1]} : vector<8x96xf32> to vector<8x64xf32>
    %120 = arith.addf %118, %119 : vector<8x64xf32>
    %121 = arith.negf %120 : vector<8x64xf32>
    %122 = math.exp %121 : vector<8x64xf32>
    %cst_32 = arith.constant 1.000000e+00 : f32
    %123 = vector.broadcast %cst_32 : f32 to vector<8x64xf32>
    %124 = arith.addf %123, %122 : vector<8x64xf32>
    %125 = arith.divf %123, %124 : vector<8x64xf32>
    %126 = vector.extract_strided_slice %125 {offsets = [0, 0], sizes = [8, 32], strides = [1, 1]} : vector<8x64xf32> to vector<8x32xf32>
    %127 = vector.extract_strided_slice %125 {offsets = [0, 32], sizes = [8, 32], strides = [1, 1]} : vector<8x64xf32> to vector<8x32xf32>
    %128 = vector.extract_strided_slice %117 {offsets = [0, 64], sizes = [8, 32], strides = [1, 1]} : vector<8x96xf32> to vector<8x32xf32>
    %129 = vector.extract_strided_slice %114 {offsets = [0, 64], sizes = [8, 32], strides = [1, 1]} : vector<8x96xf32> to vector<8x32xf32>
    %130 = vector.broadcast %6 : vector<1x32xf32> to vector<8x32xf32>
    %131 = arith.addf %129, %130 : vector<8x32xf32>
    %132 = arith.mulf %126, %131 : vector<8x32xf32>
    %133 = arith.addf %128, %132 : vector<8x32xf32>
    %134 = math.tanh %133 : vector<8x32xf32>
    %135 = arith.subf %88, %134 : vector<8x32xf32>
    %136 = arith.mulf %127, %135 : vector<8x32xf32>
    %137 = arith.addf %134, %136 : vector<8x32xf32>
    %138 = arith.truncf %137 : vector<8x32xf32> to vector<8x32xbf16>
    %cst_33 = arith.constant dense<0.000000e+00> : vector<8x96xf32>
    %139 = tpu.matmul %138, %1, %cst_33 {dimension_numbers = #tpu.dot_dimension_numbers<[1], [0], [0], [1], [0, 0, 1, 1], [], []>} : vector<8x32xbf16>, vector<32x96xbf16>, vector<8x96xf32> -> vector<8x96xf32>
    %140 = vector.broadcast %5 : vector<1x96xf32> to vector<8x96xf32>
    %141 = arith.addf %139, %140 : vector<8x96xf32>
    %142 = vector.extract_strided_slice %141 {offsets = [0, 0], sizes = [8, 64], strides = [1, 1]} : vector<8x96xf32> to vector<8x64xf32>
    %143 = vector.extract_strided_slice %116 {offsets = [0, 0], sizes = [8, 64], strides = [1, 1]} : vector<8x96xf32> to vector<8x64xf32>
    %144 = arith.addf %142, %143 : vector<8x64xf32>
    %145 = arith.negf %144 : vector<8x64xf32>
    %146 = math.exp %145 : vector<8x64xf32>
    %cst_34 = arith.constant 1.000000e+00 : f32
    %147 = vector.broadcast %cst_34 : f32 to vector<8x64xf32>
    %148 = arith.addf %147, %146 : vector<8x64xf32>
    %149 = arith.divf %147, %148 : vector<8x64xf32>
    %150 = vector.extract_strided_slice %149 {offsets = [0, 0], sizes = [8, 32], strides = [1, 1]} : vector<8x64xf32> to vector<8x32xf32>
    %151 = vector.extract_strided_slice %149 {offsets = [0, 32], sizes = [8, 32], strides = [1, 1]} : vector<8x64xf32> to vector<8x32xf32>
    %152 = vector.extract_strided_slice %141 {offsets = [0, 64], sizes = [8, 32], strides = [1, 1]} : vector<8x96xf32> to vector<8x32xf32>
    %153 = vector.extract_strided_slice %116 {offsets = [0, 64], sizes = [8, 32], strides = [1, 1]} : vector<8x96xf32> to vector<8x32xf32>
    %154 = vector.broadcast %7 : vector<1x32xf32> to vector<8x32xf32>
    %155 = arith.addf %153, %154 : vector<8x32xf32>
    %156 = arith.mulf %150, %155 : vector<8x32xf32>
    %157 = arith.addf %152, %156 : vector<8x32xf32>
    %158 = math.tanh %157 : vector<8x32xf32>
    %159 = arith.subf %112, %158 : vector<8x32xf32>
    %160 = arith.mulf %151, %159 : vector<8x32xf32>
    %161 = arith.addf %158, %160 : vector<8x32xf32>
    %162 = arith.truncf %137 : vector<8x32xf32> to vector<8x32xbf16>
    %cst_35 = arith.constant dense<0.000000e+00> : vector<8x96xf32>
    %163 = tpu.matmul %162, %2, %cst_35 {dimension_numbers = #tpu.dot_dimension_numbers<[1], [0], [0], [1], [0, 0, 1, 1], [], []>} : vector<8x32xbf16>, vector<32x96xbf16>, vector<8x96xf32> -> vector<8x96xf32>
    %164 = arith.truncf %161 : vector<8x32xf32> to vector<8x32xbf16>
    %cst_36 = arith.constant dense<0.000000e+00> : vector<8x96xf32>
    %165 = tpu.matmul %164, %3, %cst_36 {dimension_numbers = #tpu.dot_dimension_numbers<[1], [0], [0], [1], [0, 0, 1, 1], [], []>} : vector<8x32xbf16>, vector<32x96xbf16>, vector<8x96xf32> -> vector<8x96xf32>
    %166 = vector.extract_strided_slice %12 {offsets = [24, 0], sizes = [8, 96], strides = [1, 1]} : vector<64x96xf32> to vector<8x96xf32>
    %167 = vector.extract_strided_slice %166 {offsets = [0, 0], sizes = [8, 64], strides = [1, 1]} : vector<8x96xf32> to vector<8x64xf32>
    %168 = vector.extract_strided_slice %163 {offsets = [0, 0], sizes = [8, 64], strides = [1, 1]} : vector<8x96xf32> to vector<8x64xf32>
    %169 = arith.addf %167, %168 : vector<8x64xf32>
    %170 = arith.negf %169 : vector<8x64xf32>
    %171 = math.exp %170 : vector<8x64xf32>
    %cst_37 = arith.constant 1.000000e+00 : f32
    %172 = vector.broadcast %cst_37 : f32 to vector<8x64xf32>
    %173 = arith.addf %172, %171 : vector<8x64xf32>
    %174 = arith.divf %172, %173 : vector<8x64xf32>
    %175 = vector.extract_strided_slice %174 {offsets = [0, 0], sizes = [8, 32], strides = [1, 1]} : vector<8x64xf32> to vector<8x32xf32>
    %176 = vector.extract_strided_slice %174 {offsets = [0, 32], sizes = [8, 32], strides = [1, 1]} : vector<8x64xf32> to vector<8x32xf32>
    %177 = vector.extract_strided_slice %166 {offsets = [0, 64], sizes = [8, 32], strides = [1, 1]} : vector<8x96xf32> to vector<8x32xf32>
    %178 = vector.extract_strided_slice %163 {offsets = [0, 64], sizes = [8, 32], strides = [1, 1]} : vector<8x96xf32> to vector<8x32xf32>
    %179 = vector.broadcast %6 : vector<1x32xf32> to vector<8x32xf32>
    %180 = arith.addf %178, %179 : vector<8x32xf32>
    %181 = arith.mulf %175, %180 : vector<8x32xf32>
    %182 = arith.addf %177, %181 : vector<8x32xf32>
    %183 = math.tanh %182 : vector<8x32xf32>
    %184 = arith.subf %137, %183 : vector<8x32xf32>
    %185 = arith.mulf %176, %184 : vector<8x32xf32>
    %186 = arith.addf %183, %185 : vector<8x32xf32>
    %187 = arith.truncf %186 : vector<8x32xf32> to vector<8x32xbf16>
    %cst_38 = arith.constant dense<0.000000e+00> : vector<8x96xf32>
    %188 = tpu.matmul %187, %1, %cst_38 {dimension_numbers = #tpu.dot_dimension_numbers<[1], [0], [0], [1], [0, 0, 1, 1], [], []>} : vector<8x32xbf16>, vector<32x96xbf16>, vector<8x96xf32> -> vector<8x96xf32>
    %189 = vector.broadcast %5 : vector<1x96xf32> to vector<8x96xf32>
    %190 = arith.addf %188, %189 : vector<8x96xf32>
    %191 = vector.extract_strided_slice %190 {offsets = [0, 0], sizes = [8, 64], strides = [1, 1]} : vector<8x96xf32> to vector<8x64xf32>
    %192 = vector.extract_strided_slice %165 {offsets = [0, 0], sizes = [8, 64], strides = [1, 1]} : vector<8x96xf32> to vector<8x64xf32>
    %193 = arith.addf %191, %192 : vector<8x64xf32>
    %194 = arith.negf %193 : vector<8x64xf32>
    %195 = math.exp %194 : vector<8x64xf32>
    %cst_39 = arith.constant 1.000000e+00 : f32
    %196 = vector.broadcast %cst_39 : f32 to vector<8x64xf32>
    %197 = arith.addf %196, %195 : vector<8x64xf32>
    %198 = arith.divf %196, %197 : vector<8x64xf32>
    %199 = vector.extract_strided_slice %198 {offsets = [0, 0], sizes = [8, 32], strides = [1, 1]} : vector<8x64xf32> to vector<8x32xf32>
    %200 = vector.extract_strided_slice %198 {offsets = [0, 32], sizes = [8, 32], strides = [1, 1]} : vector<8x64xf32> to vector<8x32xf32>
    %201 = vector.extract_strided_slice %190 {offsets = [0, 64], sizes = [8, 32], strides = [1, 1]} : vector<8x96xf32> to vector<8x32xf32>
    %202 = vector.extract_strided_slice %165 {offsets = [0, 64], sizes = [8, 32], strides = [1, 1]} : vector<8x96xf32> to vector<8x32xf32>
    %203 = vector.broadcast %7 : vector<1x32xf32> to vector<8x32xf32>
    %204 = arith.addf %202, %203 : vector<8x32xf32>
    %205 = arith.mulf %199, %204 : vector<8x32xf32>
    %206 = arith.addf %201, %205 : vector<8x32xf32>
    %207 = math.tanh %206 : vector<8x32xf32>
    %208 = arith.subf %161, %207 : vector<8x32xf32>
    %209 = arith.mulf %200, %208 : vector<8x32xf32>
    %210 = arith.addf %207, %209 : vector<8x32xf32>
    %211 = arith.truncf %186 : vector<8x32xf32> to vector<8x32xbf16>
    %cst_40 = arith.constant dense<0.000000e+00> : vector<8x96xf32>
    %212 = tpu.matmul %211, %2, %cst_40 {dimension_numbers = #tpu.dot_dimension_numbers<[1], [0], [0], [1], [0, 0, 1, 1], [], []>} : vector<8x32xbf16>, vector<32x96xbf16>, vector<8x96xf32> -> vector<8x96xf32>
    %213 = arith.truncf %210 : vector<8x32xf32> to vector<8x32xbf16>
    %cst_41 = arith.constant dense<0.000000e+00> : vector<8x96xf32>
    %214 = tpu.matmul %213, %3, %cst_41 {dimension_numbers = #tpu.dot_dimension_numbers<[1], [0], [0], [1], [0, 0, 1, 1], [], []>} : vector<8x32xbf16>, vector<32x96xbf16>, vector<8x96xf32> -> vector<8x96xf32>
    %215 = vector.extract_strided_slice %12 {offsets = [32, 0], sizes = [8, 96], strides = [1, 1]} : vector<64x96xf32> to vector<8x96xf32>
    %216 = vector.extract_strided_slice %215 {offsets = [0, 0], sizes = [8, 64], strides = [1, 1]} : vector<8x96xf32> to vector<8x64xf32>
    %217 = vector.extract_strided_slice %212 {offsets = [0, 0], sizes = [8, 64], strides = [1, 1]} : vector<8x96xf32> to vector<8x64xf32>
    %218 = arith.addf %216, %217 : vector<8x64xf32>
    %219 = arith.negf %218 : vector<8x64xf32>
    %220 = math.exp %219 : vector<8x64xf32>
    %cst_42 = arith.constant 1.000000e+00 : f32
    %221 = vector.broadcast %cst_42 : f32 to vector<8x64xf32>
    %222 = arith.addf %221, %220 : vector<8x64xf32>
    %223 = arith.divf %221, %222 : vector<8x64xf32>
    %224 = vector.extract_strided_slice %223 {offsets = [0, 0], sizes = [8, 32], strides = [1, 1]} : vector<8x64xf32> to vector<8x32xf32>
    %225 = vector.extract_strided_slice %223 {offsets = [0, 32], sizes = [8, 32], strides = [1, 1]} : vector<8x64xf32> to vector<8x32xf32>
    %226 = vector.extract_strided_slice %215 {offsets = [0, 64], sizes = [8, 32], strides = [1, 1]} : vector<8x96xf32> to vector<8x32xf32>
    %227 = vector.extract_strided_slice %212 {offsets = [0, 64], sizes = [8, 32], strides = [1, 1]} : vector<8x96xf32> to vector<8x32xf32>
    %228 = vector.broadcast %6 : vector<1x32xf32> to vector<8x32xf32>
    %229 = arith.addf %227, %228 : vector<8x32xf32>
    %230 = arith.mulf %224, %229 : vector<8x32xf32>
    %231 = arith.addf %226, %230 : vector<8x32xf32>
    %232 = math.tanh %231 : vector<8x32xf32>
    %233 = arith.subf %186, %232 : vector<8x32xf32>
    %234 = arith.mulf %225, %233 : vector<8x32xf32>
    %235 = arith.addf %232, %234 : vector<8x32xf32>
    %236 = arith.truncf %235 : vector<8x32xf32> to vector<8x32xbf16>
    %cst_43 = arith.constant dense<0.000000e+00> : vector<8x96xf32>
    %237 = tpu.matmul %236, %1, %cst_43 {dimension_numbers = #tpu.dot_dimension_numbers<[1], [0], [0], [1], [0, 0, 1, 1], [], []>} : vector<8x32xbf16>, vector<32x96xbf16>, vector<8x96xf32> -> vector<8x96xf32>
    %238 = vector.broadcast %5 : vector<1x96xf32> to vector<8x96xf32>
    %239 = arith.addf %237, %238 : vector<8x96xf32>
    %240 = vector.extract_strided_slice %239 {offsets = [0, 0], sizes = [8, 64], strides = [1, 1]} : vector<8x96xf32> to vector<8x64xf32>
    %241 = vector.extract_strided_slice %214 {offsets = [0, 0], sizes = [8, 64], strides = [1, 1]} : vector<8x96xf32> to vector<8x64xf32>
    %242 = arith.addf %240, %241 : vector<8x64xf32>
    %243 = arith.negf %242 : vector<8x64xf32>
    %244 = math.exp %243 : vector<8x64xf32>
    %cst_44 = arith.constant 1.000000e+00 : f32
    %245 = vector.broadcast %cst_44 : f32 to vector<8x64xf32>
    %246 = arith.addf %245, %244 : vector<8x64xf32>
    %247 = arith.divf %245, %246 : vector<8x64xf32>
    %248 = vector.extract_strided_slice %247 {offsets = [0, 0], sizes = [8, 32], strides = [1, 1]} : vector<8x64xf32> to vector<8x32xf32>
    %249 = vector.extract_strided_slice %247 {offsets = [0, 32], sizes = [8, 32], strides = [1, 1]} : vector<8x64xf32> to vector<8x32xf32>
    %250 = vector.extract_strided_slice %239 {offsets = [0, 64], sizes = [8, 32], strides = [1, 1]} : vector<8x96xf32> to vector<8x32xf32>
    %251 = vector.extract_strided_slice %214 {offsets = [0, 64], sizes = [8, 32], strides = [1, 1]} : vector<8x96xf32> to vector<8x32xf32>
    %252 = vector.broadcast %7 : vector<1x32xf32> to vector<8x32xf32>
    %253 = arith.addf %251, %252 : vector<8x32xf32>
    %254 = arith.mulf %248, %253 : vector<8x32xf32>
    %255 = arith.addf %250, %254 : vector<8x32xf32>
    %256 = math.tanh %255 : vector<8x32xf32>
    %257 = arith.subf %210, %256 : vector<8x32xf32>
    %258 = arith.mulf %249, %257 : vector<8x32xf32>
    %259 = arith.addf %256, %258 : vector<8x32xf32>
    %260 = arith.truncf %235 : vector<8x32xf32> to vector<8x32xbf16>
    %cst_45 = arith.constant dense<0.000000e+00> : vector<8x96xf32>
    %261 = tpu.matmul %260, %2, %cst_45 {dimension_numbers = #tpu.dot_dimension_numbers<[1], [0], [0], [1], [0, 0, 1, 1], [], []>} : vector<8x32xbf16>, vector<32x96xbf16>, vector<8x96xf32> -> vector<8x96xf32>
    %262 = arith.truncf %259 : vector<8x32xf32> to vector<8x32xbf16>
    %cst_46 = arith.constant dense<0.000000e+00> : vector<8x96xf32>
    %263 = tpu.matmul %262, %3, %cst_46 {dimension_numbers = #tpu.dot_dimension_numbers<[1], [0], [0], [1], [0, 0, 1, 1], [], []>} : vector<8x32xbf16>, vector<32x96xbf16>, vector<8x96xf32> -> vector<8x96xf32>
    %264 = vector.extract_strided_slice %12 {offsets = [40, 0], sizes = [8, 96], strides = [1, 1]} : vector<64x96xf32> to vector<8x96xf32>
    %265 = vector.extract_strided_slice %264 {offsets = [0, 0], sizes = [8, 64], strides = [1, 1]} : vector<8x96xf32> to vector<8x64xf32>
    %266 = vector.extract_strided_slice %261 {offsets = [0, 0], sizes = [8, 64], strides = [1, 1]} : vector<8x96xf32> to vector<8x64xf32>
    %267 = arith.addf %265, %266 : vector<8x64xf32>
    %268 = arith.negf %267 : vector<8x64xf32>
    %269 = math.exp %268 : vector<8x64xf32>
    %cst_47 = arith.constant 1.000000e+00 : f32
    %270 = vector.broadcast %cst_47 : f32 to vector<8x64xf32>
    %271 = arith.addf %270, %269 : vector<8x64xf32>
    %272 = arith.divf %270, %271 : vector<8x64xf32>
    %273 = vector.extract_strided_slice %272 {offsets = [0, 0], sizes = [8, 32], strides = [1, 1]} : vector<8x64xf32> to vector<8x32xf32>
    %274 = vector.extract_strided_slice %272 {offsets = [0, 32], sizes = [8, 32], strides = [1, 1]} : vector<8x64xf32> to vector<8x32xf32>
    %275 = vector.extract_strided_slice %264 {offsets = [0, 64], sizes = [8, 32], strides = [1, 1]} : vector<8x96xf32> to vector<8x32xf32>
    %276 = vector.extract_strided_slice %261 {offsets = [0, 64], sizes = [8, 32], strides = [1, 1]} : vector<8x96xf32> to vector<8x32xf32>
    %277 = vector.broadcast %6 : vector<1x32xf32> to vector<8x32xf32>
    %278 = arith.addf %276, %277 : vector<8x32xf32>
    %279 = arith.mulf %273, %278 : vector<8x32xf32>
    %280 = arith.addf %275, %279 : vector<8x32xf32>
    %281 = math.tanh %280 : vector<8x32xf32>
    %282 = arith.subf %235, %281 : vector<8x32xf32>
    %283 = arith.mulf %274, %282 : vector<8x32xf32>
    %284 = arith.addf %281, %283 : vector<8x32xf32>
    %285 = arith.truncf %284 : vector<8x32xf32> to vector<8x32xbf16>
    %cst_48 = arith.constant dense<0.000000e+00> : vector<8x96xf32>
    %286 = tpu.matmul %285, %1, %cst_48 {dimension_numbers = #tpu.dot_dimension_numbers<[1], [0], [0], [1], [0, 0, 1, 1], [], []>} : vector<8x32xbf16>, vector<32x96xbf16>, vector<8x96xf32> -> vector<8x96xf32>
    %287 = vector.broadcast %5 : vector<1x96xf32> to vector<8x96xf32>
    %288 = arith.addf %286, %287 : vector<8x96xf32>
    %289 = vector.extract_strided_slice %288 {offsets = [0, 0], sizes = [8, 64], strides = [1, 1]} : vector<8x96xf32> to vector<8x64xf32>
    %290 = vector.extract_strided_slice %263 {offsets = [0, 0], sizes = [8, 64], strides = [1, 1]} : vector<8x96xf32> to vector<8x64xf32>
    %291 = arith.addf %289, %290 : vector<8x64xf32>
    %292 = arith.negf %291 : vector<8x64xf32>
    %293 = math.exp %292 : vector<8x64xf32>
    %cst_49 = arith.constant 1.000000e+00 : f32
    %294 = vector.broadcast %cst_49 : f32 to vector<8x64xf32>
    %295 = arith.addf %294, %293 : vector<8x64xf32>
    %296 = arith.divf %294, %295 : vector<8x64xf32>
    %297 = vector.extract_strided_slice %296 {offsets = [0, 0], sizes = [8, 32], strides = [1, 1]} : vector<8x64xf32> to vector<8x32xf32>
    %298 = vector.extract_strided_slice %296 {offsets = [0, 32], sizes = [8, 32], strides = [1, 1]} : vector<8x64xf32> to vector<8x32xf32>
    %299 = vector.extract_strided_slice %288 {offsets = [0, 64], sizes = [8, 32], strides = [1, 1]} : vector<8x96xf32> to vector<8x32xf32>
    %300 = vector.extract_strided_slice %263 {offsets = [0, 64], sizes = [8, 32], strides = [1, 1]} : vector<8x96xf32> to vector<8x32xf32>
    %301 = vector.broadcast %7 : vector<1x32xf32> to vector<8x32xf32>
    %302 = arith.addf %300, %301 : vector<8x32xf32>
    %303 = arith.mulf %297, %302 : vector<8x32xf32>
    %304 = arith.addf %299, %303 : vector<8x32xf32>
    %305 = math.tanh %304 : vector<8x32xf32>
    %306 = arith.subf %259, %305 : vector<8x32xf32>
    %307 = arith.mulf %298, %306 : vector<8x32xf32>
    %308 = arith.addf %305, %307 : vector<8x32xf32>
    %309 = arith.truncf %284 : vector<8x32xf32> to vector<8x32xbf16>
    %cst_50 = arith.constant dense<0.000000e+00> : vector<8x96xf32>
    %310 = tpu.matmul %309, %2, %cst_50 {dimension_numbers = #tpu.dot_dimension_numbers<[1], [0], [0], [1], [0, 0, 1, 1], [], []>} : vector<8x32xbf16>, vector<32x96xbf16>, vector<8x96xf32> -> vector<8x96xf32>
    %311 = arith.truncf %308 : vector<8x32xf32> to vector<8x32xbf16>
    %cst_51 = arith.constant dense<0.000000e+00> : vector<8x96xf32>
    %312 = tpu.matmul %311, %3, %cst_51 {dimension_numbers = #tpu.dot_dimension_numbers<[1], [0], [0], [1], [0, 0, 1, 1], [], []>} : vector<8x32xbf16>, vector<32x96xbf16>, vector<8x96xf32> -> vector<8x96xf32>
    %313 = vector.extract_strided_slice %12 {offsets = [48, 0], sizes = [8, 96], strides = [1, 1]} : vector<64x96xf32> to vector<8x96xf32>
    %314 = vector.extract_strided_slice %313 {offsets = [0, 0], sizes = [8, 64], strides = [1, 1]} : vector<8x96xf32> to vector<8x64xf32>
    %315 = vector.extract_strided_slice %310 {offsets = [0, 0], sizes = [8, 64], strides = [1, 1]} : vector<8x96xf32> to vector<8x64xf32>
    %316 = arith.addf %314, %315 : vector<8x64xf32>
    %317 = arith.negf %316 : vector<8x64xf32>
    %318 = math.exp %317 : vector<8x64xf32>
    %cst_52 = arith.constant 1.000000e+00 : f32
    %319 = vector.broadcast %cst_52 : f32 to vector<8x64xf32>
    %320 = arith.addf %319, %318 : vector<8x64xf32>
    %321 = arith.divf %319, %320 : vector<8x64xf32>
    %322 = vector.extract_strided_slice %321 {offsets = [0, 0], sizes = [8, 32], strides = [1, 1]} : vector<8x64xf32> to vector<8x32xf32>
    %323 = vector.extract_strided_slice %321 {offsets = [0, 32], sizes = [8, 32], strides = [1, 1]} : vector<8x64xf32> to vector<8x32xf32>
    %324 = vector.extract_strided_slice %313 {offsets = [0, 64], sizes = [8, 32], strides = [1, 1]} : vector<8x96xf32> to vector<8x32xf32>
    %325 = vector.extract_strided_slice %310 {offsets = [0, 64], sizes = [8, 32], strides = [1, 1]} : vector<8x96xf32> to vector<8x32xf32>
    %326 = vector.broadcast %6 : vector<1x32xf32> to vector<8x32xf32>
    %327 = arith.addf %325, %326 : vector<8x32xf32>
    %328 = arith.mulf %322, %327 : vector<8x32xf32>
    %329 = arith.addf %324, %328 : vector<8x32xf32>
    %330 = math.tanh %329 : vector<8x32xf32>
    %331 = arith.subf %284, %330 : vector<8x32xf32>
    %332 = arith.mulf %323, %331 : vector<8x32xf32>
    %333 = arith.addf %330, %332 : vector<8x32xf32>
    %334 = arith.truncf %333 : vector<8x32xf32> to vector<8x32xbf16>
    %cst_53 = arith.constant dense<0.000000e+00> : vector<8x96xf32>
    %335 = tpu.matmul %334, %1, %cst_53 {dimension_numbers = #tpu.dot_dimension_numbers<[1], [0], [0], [1], [0, 0, 1, 1], [], []>} : vector<8x32xbf16>, vector<32x96xbf16>, vector<8x96xf32> -> vector<8x96xf32>
    %336 = vector.broadcast %5 : vector<1x96xf32> to vector<8x96xf32>
    %337 = arith.addf %335, %336 : vector<8x96xf32>
    %338 = vector.extract_strided_slice %337 {offsets = [0, 0], sizes = [8, 64], strides = [1, 1]} : vector<8x96xf32> to vector<8x64xf32>
    %339 = vector.extract_strided_slice %312 {offsets = [0, 0], sizes = [8, 64], strides = [1, 1]} : vector<8x96xf32> to vector<8x64xf32>
    %340 = arith.addf %338, %339 : vector<8x64xf32>
    %341 = arith.negf %340 : vector<8x64xf32>
    %342 = math.exp %341 : vector<8x64xf32>
    %cst_54 = arith.constant 1.000000e+00 : f32
    %343 = vector.broadcast %cst_54 : f32 to vector<8x64xf32>
    %344 = arith.addf %343, %342 : vector<8x64xf32>
    %345 = arith.divf %343, %344 : vector<8x64xf32>
    %346 = vector.extract_strided_slice %345 {offsets = [0, 0], sizes = [8, 32], strides = [1, 1]} : vector<8x64xf32> to vector<8x32xf32>
    %347 = vector.extract_strided_slice %345 {offsets = [0, 32], sizes = [8, 32], strides = [1, 1]} : vector<8x64xf32> to vector<8x32xf32>
    %348 = vector.extract_strided_slice %337 {offsets = [0, 64], sizes = [8, 32], strides = [1, 1]} : vector<8x96xf32> to vector<8x32xf32>
    %349 = vector.extract_strided_slice %312 {offsets = [0, 64], sizes = [8, 32], strides = [1, 1]} : vector<8x96xf32> to vector<8x32xf32>
    %350 = vector.broadcast %7 : vector<1x32xf32> to vector<8x32xf32>
    %351 = arith.addf %349, %350 : vector<8x32xf32>
    %352 = arith.mulf %346, %351 : vector<8x32xf32>
    %353 = arith.addf %348, %352 : vector<8x32xf32>
    %354 = math.tanh %353 : vector<8x32xf32>
    %355 = arith.subf %308, %354 : vector<8x32xf32>
    %356 = arith.mulf %347, %355 : vector<8x32xf32>
    %357 = arith.addf %354, %356 : vector<8x32xf32>
    %358 = arith.truncf %333 : vector<8x32xf32> to vector<8x32xbf16>
    %cst_55 = arith.constant dense<0.000000e+00> : vector<8x96xf32>
    %359 = tpu.matmul %358, %2, %cst_55 {dimension_numbers = #tpu.dot_dimension_numbers<[1], [0], [0], [1], [0, 0, 1, 1], [], []>} : vector<8x32xbf16>, vector<32x96xbf16>, vector<8x96xf32> -> vector<8x96xf32>
    %360 = arith.truncf %357 : vector<8x32xf32> to vector<8x32xbf16>
    %cst_56 = arith.constant dense<0.000000e+00> : vector<8x96xf32>
    %361 = tpu.matmul %360, %3, %cst_56 {dimension_numbers = #tpu.dot_dimension_numbers<[1], [0], [0], [1], [0, 0, 1, 1], [], []>} : vector<8x32xbf16>, vector<32x96xbf16>, vector<8x96xf32> -> vector<8x96xf32>
    %362 = vector.extract_strided_slice %12 {offsets = [56, 0], sizes = [8, 96], strides = [1, 1]} : vector<64x96xf32> to vector<8x96xf32>
    %363 = vector.extract_strided_slice %362 {offsets = [0, 0], sizes = [8, 64], strides = [1, 1]} : vector<8x96xf32> to vector<8x64xf32>
    %364 = vector.extract_strided_slice %359 {offsets = [0, 0], sizes = [8, 64], strides = [1, 1]} : vector<8x96xf32> to vector<8x64xf32>
    %365 = arith.addf %363, %364 : vector<8x64xf32>
    %366 = arith.negf %365 : vector<8x64xf32>
    %367 = math.exp %366 : vector<8x64xf32>
    %cst_57 = arith.constant 1.000000e+00 : f32
    %368 = vector.broadcast %cst_57 : f32 to vector<8x64xf32>
    %369 = arith.addf %368, %367 : vector<8x64xf32>
    %370 = arith.divf %368, %369 : vector<8x64xf32>
    %371 = vector.extract_strided_slice %370 {offsets = [0, 0], sizes = [8, 32], strides = [1, 1]} : vector<8x64xf32> to vector<8x32xf32>
    %372 = vector.extract_strided_slice %370 {offsets = [0, 32], sizes = [8, 32], strides = [1, 1]} : vector<8x64xf32> to vector<8x32xf32>
    %373 = vector.extract_strided_slice %362 {offsets = [0, 64], sizes = [8, 32], strides = [1, 1]} : vector<8x96xf32> to vector<8x32xf32>
    %374 = vector.extract_strided_slice %359 {offsets = [0, 64], sizes = [8, 32], strides = [1, 1]} : vector<8x96xf32> to vector<8x32xf32>
    %375 = vector.broadcast %6 : vector<1x32xf32> to vector<8x32xf32>
    %376 = arith.addf %374, %375 : vector<8x32xf32>
    %377 = arith.mulf %371, %376 : vector<8x32xf32>
    %378 = arith.addf %373, %377 : vector<8x32xf32>
    %379 = math.tanh %378 : vector<8x32xf32>
    %380 = arith.subf %333, %379 : vector<8x32xf32>
    %381 = arith.mulf %372, %380 : vector<8x32xf32>
    %382 = arith.addf %379, %381 : vector<8x32xf32>
    %383 = arith.truncf %382 : vector<8x32xf32> to vector<8x32xbf16>
    %cst_58 = arith.constant dense<0.000000e+00> : vector<8x96xf32>
    %384 = tpu.matmul %383, %1, %cst_58 {dimension_numbers = #tpu.dot_dimension_numbers<[1], [0], [0], [1], [0, 0, 1, 1], [], []>} : vector<8x32xbf16>, vector<32x96xbf16>, vector<8x96xf32> -> vector<8x96xf32>
    %385 = vector.broadcast %5 : vector<1x96xf32> to vector<8x96xf32>
    %386 = arith.addf %384, %385 : vector<8x96xf32>
    %387 = vector.extract_strided_slice %386 {offsets = [0, 0], sizes = [8, 64], strides = [1, 1]} : vector<8x96xf32> to vector<8x64xf32>
    %388 = vector.extract_strided_slice %361 {offsets = [0, 0], sizes = [8, 64], strides = [1, 1]} : vector<8x96xf32> to vector<8x64xf32>
    %389 = arith.addf %387, %388 : vector<8x64xf32>
    %390 = arith.negf %389 : vector<8x64xf32>
    %391 = math.exp %390 : vector<8x64xf32>
    %cst_59 = arith.constant 1.000000e+00 : f32
    %392 = vector.broadcast %cst_59 : f32 to vector<8x64xf32>
    %393 = arith.addf %392, %391 : vector<8x64xf32>
    %394 = arith.divf %392, %393 : vector<8x64xf32>
    %395 = vector.extract_strided_slice %394 {offsets = [0, 0], sizes = [8, 32], strides = [1, 1]} : vector<8x64xf32> to vector<8x32xf32>
    %396 = vector.extract_strided_slice %394 {offsets = [0, 32], sizes = [8, 32], strides = [1, 1]} : vector<8x64xf32> to vector<8x32xf32>
    %397 = vector.extract_strided_slice %386 {offsets = [0, 64], sizes = [8, 32], strides = [1, 1]} : vector<8x96xf32> to vector<8x32xf32>
    %398 = vector.extract_strided_slice %361 {offsets = [0, 64], sizes = [8, 32], strides = [1, 1]} : vector<8x96xf32> to vector<8x32xf32>
    %399 = vector.broadcast %7 : vector<1x32xf32> to vector<8x32xf32>
    %400 = arith.addf %398, %399 : vector<8x32xf32>
    %401 = arith.mulf %395, %400 : vector<8x32xf32>
    %402 = arith.addf %397, %401 : vector<8x32xf32>
    %403 = math.tanh %402 : vector<8x32xf32>
    %404 = arith.subf %357, %403 : vector<8x32xf32>
    %405 = arith.mulf %396, %404 : vector<8x32xf32>
    %406 = arith.addf %403, %405 : vector<8x32xf32>
    %c0_60 = arith.constant 0 : index
    %c0_61 = arith.constant 0 : index
    %c0_62 = arith.constant 0 : index
    %407 = vector.load %arg13[%c0_60, %c0_61, %c0_62] : memref<2x8x32xf32, #tpu.memory_space<vmem>>, vector<1x8x32xf32>
    %408 = vector.shape_cast %407 : vector<1x8x32xf32> to vector<8x32xf32>
    %409 = vector.shape_cast %382 : vector<8x32xf32> to vector<1x8x32xf32>
    tpu.vector_store %arg13[%c0_60, %c0_61, %c0_62], %409 {strides = array<i32>} : memref<2x8x32xf32, #tpu.memory_space<vmem>>, vector<1x8x32xf32>,
    %c1 = arith.constant 1 : index
    %c0_63 = arith.constant 0 : index
    %c0_64 = arith.constant 0 : index
    %410 = vector.load %arg13[%c1, %c0_63, %c0_64] : memref<2x8x32xf32, #tpu.memory_space<vmem>>, vector<1x8x32xf32>
    %411 = vector.shape_cast %410 : vector<1x8x32xf32> to vector<8x32xf32>
    %412 = vector.shape_cast %406 : vector<8x32xf32> to vector<1x8x32xf32>
    tpu.vector_store %arg13[%c1, %c0_63, %c0_64], %412 {strides = array<i32>} : memref<2x8x32xf32, #tpu.memory_space<vmem>>, vector<1x8x32xf32>,
    %413 = arith.truncf %406 : vector<8x32xf32> to vector<8x32xbf16>
    %c0_65 = arith.constant 0 : index
    %c0_66 = arith.constant 0 : index
    %414 = vector.load %arg10[%c0_65, %c0_66] : memref<32x8xbf16, #tpu.memory_space<vmem>>, vector<32x8xbf16>
    %cst_67 = arith.constant dense<0.000000e+00> : vector<8x8xf32>
    %415 = tpu.matmul %413, %414, %cst_67 {dimension_numbers = #tpu.dot_dimension_numbers<[1], [0], [0], [1], [0, 0, 1, 1], [], []>} : vector<8x32xbf16>, vector<32x8xbf16>, vector<8x8xf32> -> vector<8x8xf32>
    %c0_68 = arith.constant 0 : index
    %c0_69 = arith.constant 0 : index
    %416 = vector.load %arg11[%c0_68, %c0_69] : memref<1x8xf32, #tpu.memory_space<vmem>>, vector<1x8xf32>
    %417 = vector.broadcast %416 : vector<1x8xf32> to vector<8x8xf32>
    %418 = arith.addf %415, %417 : vector<8x8xf32>
    %cst_70 = arith.constant dense<0xFF800000> : vector<8xf32>
    %419 = vector.multi_reduction <maximumf>, %418, %cst_70 [1] : vector<8x8xf32> to vector<8xf32>
    %420 = vector.shape_cast %419 : vector<8xf32> to vector<8x1xf32>
    %421 = vector.broadcast %420 : vector<8x1xf32> to vector<8x8xf32>
    %422 = arith.subf %418, %421 : vector<8x8xf32>
    %423 = math.exp %422 : vector<8x8xf32>
    %cst_71 = arith.constant dense<0.000000e+00> : vector<8xf32>
    %424 = vector.multi_reduction <add>, %423, %cst_71 [1] : vector<8x8xf32> to vector<8xf32>
    %425 = vector.shape_cast %424 : vector<8xf32> to vector<8x1xf32>
    %426 = tpu.reciprocal %425 {approx = true} : vector<8x1xf32> -> vector<8x1xf32>
    %427 = vector.broadcast %426 : vector<8x1xf32> to vector<8x8xf32>
    %428 = arith.mulf %423, %427 : vector<8x8xf32>
    %c0_72 = arith.constant 0 : index
    %c0_73 = arith.constant 0 : index
    %429 = vector.load %arg12[%c0_72, %c0_73] : memref<8x8xf32, #tpu.memory_space<vmem>>, vector<8x8xf32>
    tpu.vector_store %arg12[%c0_72, %c0_73], %428 {strides = array<i32>} : memref<8x8xf32, #tpu.memory_space<vmem>>, vector<8x8xf32>,
    return
  }
  func.func @transform_0(%arg0: i32) -> (i32, i32, i32) {
    %c0_i32 = arith.constant 0 : i32
    %c0_i32_0 = arith.constant 0 : i32
    %c0_i32_1 = arith.constant 0 : i32
    %c0_i32_2 = arith.constant 0 : i32
    return %c0_i32, %c0_i32_0, %c0_i32_1 : i32, i32, i32
  }
  func.func @transform_1(%arg0: i32) -> (i32, i32) {
    %c0_i32 = arith.constant 0 : i32
    %c0_i32_0 = arith.constant 0 : i32
    %c0_i32_1 = arith.constant 0 : i32
    return %c0_i32, %c0_i32_0 : i32, i32
  }
  func.func @transform_2(%arg0: i32) -> (i32, i32) {
    %c0_i32 = arith.constant 0 : i32
    %c0_i32_0 = arith.constant 0 : i32
    %c0_i32_1 = arith.constant 0 : i32
    return %c0_i32, %c0_i32_0 : i32, i32
  }
  func.func @transform_3(%arg0: i32) -> (i32, i32) {
    %c0_i32 = arith.constant 0 : i32
    %c0_i32_0 = arith.constant 0 : i32
    %c0_i32_1 = arith.constant 0 : i32
    return %c0_i32, %c0_i32_0 : i32, i32
  }
  func.func @transform_4(%arg0: i32) -> (i32, i32) {
    %c0_i32 = arith.constant 0 : i32
    %c0_i32_0 = arith.constant 0 : i32
    %c0_i32_1 = arith.constant 0 : i32
    return %c0_i32, %c0_i32_0 : i32, i32
  }
  func.func @transform_5(%arg0: i32) -> (i32, i32) {
    %c0_i32 = arith.constant 0 : i32
    %c0_i32_0 = arith.constant 0 : i32
    %c0_i32_1 = arith.constant 0 : i32
    return %c0_i32, %c0_i32_0 : i32, i32
  }
  func.func @transform_6(%arg0: i32) -> (i32, i32) {
    %c0_i32 = arith.constant 0 : i32
    %c0_i32_0 = arith.constant 0 : i32
    %c0_i32_1 = arith.constant 0 : i32
    return %c0_i32, %c0_i32_0 : i32, i32
  }
  func.func @transform_7(%arg0: i32) -> (i32, i32) {
    %c0_i32 = arith.constant 0 : i32
    %c0_i32_0 = arith.constant 0 : i32
    %c0_i32_1 = arith.constant 0 : i32
    return %c0_i32, %c0_i32_0 : i32, i32
  }
  func.func @transform_8(%arg0: i32) -> (i32, i32) {
    %c0_i32 = arith.constant 0 : i32
    %c0_i32_0 = arith.constant 0 : i32
    %c0_i32_1 = arith.constant 0 : i32
    return %c0_i32, %c0_i32_0 : i32, i32
  }
  func.func @transform_9(%arg0: i32) -> (i32, i32) {
    %c0_i32 = arith.constant 0 : i32
    %c0_i32_0 = arith.constant 0 : i32
    %c0_i32_1 = arith.constant 0 : i32
    return %c0_i32, %c0_i32_0 : i32, i32
  }
  func.func @transform_10(%arg0: i32) -> (i32, i32) {
    %c0_i32 = arith.constant 0 : i32
    %c0_i32_0 = arith.constant 0 : i32
    %c0_i32_1 = arith.constant 0 : i32
    return %c0_i32, %c0_i32_0 : i32, i32
  }
  func.func @transform_11(%arg0: i32) -> (i32, i32) {
    %c0_i32 = arith.constant 0 : i32
    %c0_i32_0 = arith.constant 0 : i32
    %c0_i32_1 = arith.constant 0 : i32
    return %c0_i32, %c0_i32_0 : i32, i32
  }
  func.func @transform_12(%arg0: i32) -> (i32, i32, i32) {
    %c0_i32 = arith.constant 0 : i32
    %c0_i32_0 = arith.constant 0 : i32
    %c0_i32_1 = arith.constant 0 : i32
    %c0_i32_2 = arith.constant 0 : i32
    return %c0_i32, %c0_i32_0, %c0_i32_1 : i32, i32, i32
  }
}

</mosaic_0001>

<bundles_post_ra>
// kernel: tpu_custom_call.1
= control target key start
LH: loop header
LB: loop body
LE: loop exit
PB: predicated region body
PF: predicated region fallthrough
CT: control target
= control target key end

     0   :  { %18 = vsyncpa [#allocation3], 0  ;;  %s3173_s0 = inlined_call_operand.hbm [shape: bf16[8,8,64], index: 0, kind: input, shape index: {}]   ;;  %s3174_s1 = inlined_call_operand.hbm [shape: bf16[64,96], index: 1, kind: input, shape index: {}]   ;;  %s3175_s2 = inlined_call_operand.vmem [shape: bf16[32,96], index: 2, kind: input, shape index: {}]   ;;  %s3176_s3 = inlined_call_operand.vmem [shape: f32[1,96], index: 3, kind: input, shape index: {}]   ;;  %s3177_s4 = inlined_call_operand.vmem [shape: f32[1,32], index: 4, kind: input, shape index: {}]   ;;  %s3178_s5 = inlined_call_operand.hbm [shape: bf16[32,96], index: 5, kind: input, shape index: {}]   ;;  %s3179_s6 = inlined_call_operand.hbm [shape: bf16[32,96], index: 6, kind: input, shape index: {}]   ;;  %s3180_s7 = inlined_call_operand.vmem [shape: f32[1,96], index: 7, kind: input, shape index: {}]   ;;  %s3181_s8 = inlined_call_operand.vmem [shape: f32[1,32], index: 8, kind: input, shape index: {}]   ;;  %s3182_s9 = inlined_call_operand.vmem [shape: bf16[32,8], index: 9, kind: input, shape index: {}]   ;;  %s3183_s10 = inlined_call_operand.vmem [shape: f32[1,8], index: 10, kind: input, shape index: {}]   ;;  %s3184_s11 = inlined_call_operand.hbm [shape: f32[8,8], index: 11, kind: output, shape index: {0}]   ;;  %s3185_s12 = inlined_call_operand.hbm [shape: f32[2,8,32], index: 12, kind: output, shape index: {1}]  }
   0x1   :  { %19 = vsyncpa [#allocation6], 0 }
   0x2   :  { %20 = vsyncpa [#allocation9], 0 }
   0x3   :  { %21 = vsyncpa [#allocation4], 0 }
   0x4   :  { %22 = vsyncpa [#allocation12], 0  ;;  %s2624_s21 = smov [#allocation5]   ;;  %s2625_s23 = smov [#allocation2]  }
   0x5   :  { %s40_s22 = sshll.u32 %s2624_s21, 4  ;;  %s28_s24 = sshll.u32 %s2625_s23, 4  ;;  %s41_s22 = int_to_ptr.vmem [resolvable:$true] %s40_s22  ;;  %s29_s24 = int_to_ptr.vmem [resolvable:$true] %s28_s24 }
   0x6   :  { %s2502_s25 = scalar_lea.vmem %s41_s22, 512  ;;  %p2507_p1 = scmp.lt.s32.totalorder %s41_s22, %s41_s22 }
   0x7   :  { %p2503_p0 = scmp.ne.s32.totalorder %s41_s22, %s2502_s25  ;;  %p2508_p2 = scmp.lt.s32.totalorder %s2502_s25, %s2502_s25 }
   0x9   :  { %p2509_p3 = por %p2508_p2, %p2507_p1 }
   0xb   :  { %p2510_p4 = pnand %p2509_p3, %p2503_p0 }
   0xd   :  { %2513 = shalt.err (!%p2510_p4)
}
   0xe   :  { %s2626_s26 = smov 64   ;;  %s2627_s27 = smov 4  }
   0xf   :  { %46 = dma.hbm_to_vmem [thread:$0]  %s3174_s1, 512, %s41_s22, [#allocation6], %s2626_s26, %s2626_s26, %s2627_s27  }
  0x10   :  { %s2522_s30 = scalar_lea.vmem %s29_s24, 512  ;;  %p2527_p6 = scmp.lt.s32.totalorder %s29_s24, %s29_s24 }
  0x11   :  { %p2523_p5 = scmp.ne.s32.totalorder %s29_s24, %s2522_s30  ;;  %p2528_p7 = scmp.lt.s32.totalorder %s2522_s30, %s2522_s30 }
  0x13   :  { %p2529_p8 = por %p2528_p7, %p2527_p6 }
  0x15   :  { %p2530_p9 = pnand %p2529_p8, %p2523_p5 }
  0x17   :  { %2533 = shalt.err (!%p2530_p9)
}
  0x18   :  { %34 = dma.hbm_to_vmem [thread:$0]  %s3173_s0, 512, %s29_s24, [#allocation3], %s2626_s26, %s2626_s26, %s2627_s27  }
  0x19   :  { %s2628_s15 = smov [#allocation7]   ;;  %s2629_s17 = smov [#allocation8]  }
  0x1a   :  { %s58_s16 = sshll.u32 %s2628_s15, 4  ;;  %s70_s18 = sshll.u32 %s2629_s17, 4  ;;  %s59_s16 = int_to_ptr.vmem [resolvable:$true] %s58_s16  ;;  %s71_s18 = int_to_ptr.vmem [resolvable:$true] %s70_s18 }
  0x1b   :  { %s2542_s1 = scalar_lea.vmem %s59_s16, 256  ;;  %p2547_p11 = scmp.lt.s32.totalorder %s59_s16, %s59_s16 }
  0x1c   :  { %p2543_p10 = scmp.ne.s32.totalorder %s59_s16, %s2542_s1  ;;  %p2548_p12 = scmp.lt.s32.totalorder %s2542_s1, %s2542_s1 }
  0x1e   :  { %p2549_p13 = por %p2548_p12, %p2547_p11 }
  0x20   :  { %p2550_p0 = pnand %p2549_p13, %p2543_p10 }
  0x22   :  { %2553 = shalt.err (!%p2550_p0)
}
  0x23   :  { %64 = dma.hbm_to_vmem [thread:$0]  %s3178_s5, 256, %s59_s16, [#allocation6], %s2626_s26, %s2626_s26, %s2627_s27  }
  0x24   :  { %s2562_s0 = scalar_lea.vmem %s71_s18, 256  ;;  %p2567_p2 = scmp.lt.s32.totalorder %s71_s18, %s71_s18 }
  0x25   :  { %p2563_p1 = scmp.ne.s32.totalorder %s71_s18, %s2562_s0  ;;  %p2568_p3 = scmp.lt.s32.totalorder %s2562_s0, %s2562_s0 }
  0x27   :  { %p2569_p4 = por %p2568_p3, %p2567_p2 }
  0x29   :  { %p2570_p5 = pnand %p2569_p4, %p2563_p1 }
  0x2b   :  { %2573 = shalt.err (!%p2570_p5)
}
  0x2c   :  { %76 = dma.hbm_to_vmem [thread:$0]  %s3179_s6, 256, %s71_s18, [#allocation9], %s2626_s26, %s2626_s26, %s2627_s27  }
  0x2d   :  { %2614 = dma.done.wait [#allocation3], 512  }
  0x2e   :  { %2615 = vsyncadd [#allocation3], 4294966784 }
  0x2f   :  { %2616 = dma.done.wait [#allocation6], 768  }
  0x30   :  { %2617 = vsyncadd [#allocation6], 4294966528 }
  0x31   :  { %2618 = dma.done.wait [#allocation9], 256  }
  0x32   :  { %2619 = vsyncadd [#allocation9], 4294967040  ;;  %v2630_v0 = vmov 0.0   ;;  %vm2631_vm0 = vmmov 0   ;;  %v2370_v1 = vld [vmem:[#allocation5 + $0x18] sm:$0xff]   ;;  %v2734_v2 = vld [vmem:[%s3175_s2 + $0x8] sm:$0xff]  }
  0x33   :  { %2155 = vmatprep.subr.bf16.mxu1 %v2630_v0  ;;  %2159 = vmatprep.mubr.msk.bf16.mxu1 %vm2631_vm0, %v2630_v0  ;;  %v2372_v3 = vld [vmem:[#allocation5 + $0x10] sm:$0xff]   ;;  %v2740_v4 = vld [vmem:[%s3175_s2] sm:$0xff]   ;;  %v2374_v5 = vld [vmem:[#allocation5 + $0x8] sm:$0xff]   ;;  %vm180_vm1 = vcmask 523264   ;;  %v2632_v9 = vmov 0   ;;  %s2633_s29 = smov 96  }
  0x34   :  { %2139 = vmatprep.subr.bf16.mxu0 %v2370_v1  ;;  %2156 = vmatpush3.bf16.msra.mxu1 %v2734_v2  ;;  %v2376_v6 = vld [vmem:[#allocation2] sm:$0xff]   ;;  %v2377_v10 = vld [vmem:[#allocation2 + $0x8] sm:$0xff]   ;;  %v2772_v32 = vld [vmem:[#allocation8 + $0x8] sm:$0xff]   ;;  %s2634_s30 = smov 32   ;;  %vm270_vm2 = vcmask 261120   ;;  %vm1946_vm3 = vcmask 64512  }
  0x35   :  { %2140 = vmatpush3.bf16.msra.mxu0 %v2370_v1  ;;  %2157 = vmatprep.subr.bf16.mxu1 %v2630_v0  ;;  %v2375_v7 = vld [vmem:[#allocation5] sm:$0xff]   ;;  %v2380_v33 = vld [vmem:[#allocation2 + $0x10] sm:$0xff]   ;;  %v2381_v34 = vld [vmem:[#allocation2 + $0x18] sm:$0xff]  }
  0x36   :  { %2141 = vmatprep.subr.bf16.mxu0 %v2372_v3  ;;  %2147 = vmatprep.mubr.msk.bf16.mxu0 %vm180_vm1, %v2376_v6  ;;  %v2010_v8 = vld [vmem:[%s3177_s4] ss:$0 sm:$0xff]  ;;  %v2775_v35 = vld [vmem:[#allocation8] sm:$0xff]   ;;  %v2783_v37 = vld [vmem:[#allocation7 + $0x8] sm:$0xff]  }
  0x37   :  { %378 = vrot.lane.b32.xlu0 %v2010_v8, %s2626_s26  ;;  %v2767_v18 = vld [vmem:[%s3176_s3] ss:$0 sm:$0xff] }
  0x38   :  { %2158 = vmatpush3.bf16.msra.mxu1 %v2740_v4  ;;  %v2788_v39 = vld [vmem:[#allocation7] sm:$0xff]  }
  0x39   :  { %2142 = vmatpush3.bf16.msra.mxu0 %v2372_v3  ;;  %2163 = vmatprep.subr.bf16.mxu1 %v2630_v0  ;;  %v2016_v40 = vld [vmem:[%s3181_s8] ss:$0 sm:$0xff] }
  0x3a   :  { %2143 = vmatprep.subr.bf16.mxu0 %v2374_v5  ;;  %v2835_v57 = vld [vmem:[%s3180_s7] ss:$0 sm:$0xff] }
  0x3b   :  { %2160 = vmatmul.mubr.bf16.vlgmr.msra.gmra.mxu1 %v2632_v9 }
  0x3c   :  { %2167 = vmatprep.mubr.msk.bf16.mxu1 %vm2631_vm0, %v2630_v0  ;;  %2164 = vmatpush3.bf16.msra.mxu1 %v2772_v32 }
  0x3d   :  { %2144 = vmatpush3.bf16.msra.mxu0 %v2374_v5  ;;  %2165 = vmatprep.subr.bf16.mxu1 %v2630_v0 }
  0x3e   :  { %2145 = vmatprep.subr.bf16.mxu0 %v2375_v7 }
  0x40   :  { %2166 = vmatpush3.bf16.msra.mxu1 %v2775_v35 }
  0x41   :  { %2146 = vmatpush3.bf16.msra.mxu0 %v2375_v7  ;;  %2171 = vmatprep.subr.bf16.mxu1 %v2630_v0 }
  0x42   :  { %2179 = vmatprep.subr.bf16.mxu0 %v2630_v0 }
  0x43   :  { %2168 = vmatmul.mubr.bf16.vlgmr.msra.gmra.mxu1 %v2632_v9 }
  0x44   :  { %2148 = vmatmul.mubr.msk.bf16.vlgmr.msra.gmra.mxu0 %vm180_vm1, %v2377_v10  ;;  %2172 = vmatpush3.bf16.msra.mxu1 %v2783_v37 }
  0x45   :  { %2180 = vmatpush3.bf16.msra.mxu0 %v2734_v2  ;;  %2151 = vmatprep.mubr.msk.bf16.mxu0 %vm180_vm1, %v2380_v33 }
  0x46   :  { %2181 = vmatprep.subr.bf16.mxu0 %v2630_v0  ;;  %2175 = vmatprep.mubr.msk.bf16.mxu1 %vm2631_vm0, %v2630_v0 }
  0x47   :  { %2173 = vmatprep.subr.bf16.mxu1 %v2630_v0 }
  0x48   :  { %2174 = vmatpush3.bf16.msra.mxu1 %v2788_v39 }
  0x49   :  { %2182 = vmatpush3.bf16.msra.mxu0 %v2740_v4  ;;  %2187 = vmatprep.subr.bf16.mxu1 %v2630_v0 }
  0x4a   :  { %2195 = vmatprep.subr.bf16.mxu0 %v2630_v0 }
  0x4c   :  { %2152 = vmatmul.mubr.msk.bf16.gmra.mxu0 %vm180_vm1, %v2381_v34 }
  0x4d   :  { %2183 = vmatprep.mubr.msk.bf16.mxu0 %vm2631_vm0, %v2630_v0 }
  0xa9   :  { %v2758_v11 = vpop.permute.xlu0 %378 }
  0xfb   :  { %v308_v12 = vpop.f32.mrf.mxu1 }
  0xfc   :  { %v381_v13 = vadd.f32 %v2758_v11, %v308_v12 }
  0xfd   :  { %v2161_v14 = vpop.f32.mrf.mxu1 }
  0xfe   :  { %383 = vrot.lane.b32.xlu0 %v381_v13, %s2626_s26 }
  0xff   :  { %v311_v15 = vpop.f32.mrf.mxu1 }
 0x101   :  { %v2162_v16 = vpop.f32.mrf.mxu1 }
 0x103   :  { %v360_v45 = vpop.f32.mrf.mxu1 }
 0x104   :  { %v2762_v17 = vpop.f32.mrf.mxu0 }
 0x105   :  { %v2169_v47 = vpop.f32.mrf.mxu1 }
 0x106   :  { %v227_v19 = vpop.f32.mrf.mxu0 }
 0x107   :  { %v228_v20 = vadd.f32 %v2767_v18, %v227_v19  ;;  %v363_v48 = vpop.f32.mrf.mxu1 }
 0x108   :  { %v2822_v51 = vpop.f32.mrf.mxu0 }
 0x109   :  { %v366_v21 = vadd.f32 %v308_v12, %v228_v20  ;;  %v2170_v49 = vpop.f32.mrf.mxu1 }
 0x10a   :  { %v230_v52 = vpop.f32.mrf.mxu0 }
 0x10b   :  { %v2009_v22 = vmul.f32 -1.442695, %v366_v21  ;;  %v231_v15 = vadd.f32 %v2767_v18, %v230_v52 }
 0x10c   :  { %v2824_v53 = vpop.f32.mrf.mxu0 }
 0x10d   :  { %2386 = vpow2.f32 %v2009_v22 }
 0x10e   :  { %v2826_v54 = vpop.f32.mrf.mxu0 }
 0x110   :  { %v2828_v55 = vpop.f32.mrf.mxu0 }
 0x112   :  { %v2830_v56 = vpop.f32.mrf.mxu0 }
 0x11a   :  { %v2387_v23 = vpop.eup %2386 }
 0x11b   :  { %v370_v24 = vadd.f32 1.0, %v2387_v23 }
 0x11d   :  { %2388 = vrcp.f32 %v370_v24 }
 0x12a   :  { %v2389_v25 = vpop.eup %2388 }
 0x170   :  { %v384_v26 = vpop.permute.xlu0 %383 }
 0x171   :  { %v386_v27 = vmul.f32 %v2389_v25, %v384_v26 }
 0x173   :  { %388 = vrot.lane.b32.xlu1 %v386_v27, %s2626_s26 }
 0x1e5   :  { %v389_v28 = vpop.permute.xlu1 %388 }
 0x1e6   :  { %v391_v29 = vadd.f32 %v389_v28, %v228_v20 }
 0x1e8   :  { %2390 = vtanh.f32 %v391_v29 }
 0x1f5   :  { %v2391_v30 = vpop.eup %2390 }
 0x1f6   :  { %v393_v31 = vsub.f32 0.0, %v2391_v30 }
 0x1f8   :  { %395 = vrot.lane.b32.xlu1 %v393_v31, %s2633_s29 }
 0x26a   :  { %v396_v36 = vpop.permute.xlu1 %395 }
 0x26b   :  { %v398_v38 = vmul.f32 %v2389_v25, %v396_v36 }
 0x26d   :  { %400 = vrot.lane.b32.xlu0 %v398_v38, %s2634_s30 }
 0x271   :  { %481 = vrot.lane.b32.xlu0 %v2016_v40, %s2626_s26 }
 0x2df   :  { %v401_v41 = vpop.permute.xlu0 %400 }
 0x2e0   :  { %v2799_v42 = vadd.f32 %v2391_v30, %v401_v41 }
 0x2e2   :  { %v404_v43 = vpack.c.bf16 %v2799_v42, %v2799_v42 }
 0x2e3   :  { %v2804_v44 = vpop.permute.xlu0 %481 }
 0x2e4   :  { %412 = vrot.lane.b32.xlu1 %v404_v43, %s2626_s26  ;;  %v484_v46 = vadd.f32 %v2804_v44, %v360_v45 }
 0x2e8   :  { %486 = vrot.lane.b32.xlu1 %v484_v46, %s2626_s26 }
 0x356   :  { %v413_v50 = vpop.permute.xlu1 %412 }
 0x357   :  { %2176 = vmatmul.mubr.msk.bf16.vlgmr.msra.gmra.mxu1 %vm270_vm2, %v413_v50  ;;  %2184 = vmatmul.mubr.msk.bf16.vlgmr.msra.gmra.mxu0 %vm270_vm2, %v413_v50 }
 0x358   :  { %2188 = vmatpush3.bf16.msra.mxu1 %v2772_v32  ;;  %2191 = vmatprep.mubr.msk.bf16.mxu1 %vm2631_vm0, %v2630_v0 }
 0x359   :  { %2189 = vmatprep.subr.bf16.mxu1 %v2630_v0  ;;  %2196 = vmatpush3.bf16.msra.mxu0 %v2783_v37 }
 0x35a   :  { %2197 = vmatprep.subr.bf16.mxu0 %v2630_v0  ;;  %2199 = vmatprep.mubr.msk.bf16.mxu0 %vm2631_vm0, %v2630_v0  ;;  %v487_v12 = vpop.permute.xlu1 %486 }
 0x35c   :  { %2190 = vmatpush3.bf16.msra.mxu1 %v2775_v35 }
 0x35d   :  { %2203 = vmatprep.subr.bf16.mxu1 %v2630_v0  ;;  %2198 = vmatpush3.bf16.msra.mxu0 %v2788_v39 }
 0x35e   :  { %2211 = vmatprep.subr.bf16.mxu0 %v2630_v0 }
 0x417   :  { %v463_v58 = vpop.f32.mrf.mxu1  ;;  %v541_v59 = vpop.f32.mrf.mxu0 }
 0x418   :  { %v464_v60 = vadd.f32 %v2835_v57, %v463_v58  ;;  %v601_v61 = vadd.f32 %v541_v59, %v2758_v11  ;;  %v594_v16 = vadd.f32 %v541_v59, %v231_v15 }
 0x419   :  { %v2177_v62 = vpop.f32.mrf.mxu1  ;;  %v2185_v63 = vpop.f32.mrf.mxu0 }
 0x41a   :  { %v469_v1 = vadd.f32 %v464_v60, %v360_v45  ;;  %603 = vrot.lane.b32.xlu0 %v601_v61, %s2626_s26  ;;  %v2019_v19 = vmul.f32 -1.442695, %v594_v16 }
 0x41b   :  { %v466_v3 = vpop.f32.mrf.mxu1  ;;  %v544_v5 = vpop.f32.mrf.mxu0 }
 0x41c   :  { %v2015_v6 = vmul.f32 -1.442695, %v469_v1 }
 0x41d   :  { %v2178_v7 = vpop.f32.mrf.mxu1  ;;  %v2186_v8 = vpop.f32.mrf.mxu0 }
 0x41e   :  { %2392 = vpow2.f32 %v2015_v6 }
 0x42b   :  { %v2393_v9 = vpop.eup %2392 }
 0x42c   :  { %v473_v10 = vadd.f32 1.0, %v2393_v9 }
 0x42e   :  { %2394 = vrcp.f32 %v473_v10 }
 0x42f   :  { %2396 = vpow2.f32 %v2019_v19 }
 0x43b   :  { %v2395_v13 = vpop.eup %2394 }
 0x43c   :  { %v489_v14 = vmul.f32 %v2395_v13, %v487_v12  ;;  %v2397_v20 = vpop.eup %2396 }
 0x43d   :  { %v598_v21 = vadd.f32 1.0, %v2397_v20  ;;  %v236_v20 = vadd.f32 %v2762_v17, %v2767_v18 }
 0x43e   :  { %491 = vrot.lane.b32.xlu1 %v489_v14, %s2626_s26 }
 0x43f   :  { %2398 = vrcp.f32 %v598_v21 }
 0x44c   :  { %v2399_v22 = vpop.eup %2398 }
 0x48c   :  { %v604_v23 = vpop.permute.xlu0 %603 }
 0x48d   :  { %v606_v24 = vmul.f32 %v2399_v22, %v604_v23 }
 0x48f   :  { %608 = vrot.lane.b32.xlu0 %v606_v24, %s2626_s26 }
 0x4b0   :  { %v492_v25 = vpop.permute.xlu1 %491 }
 0x4b1   :  { %v494_v26 = vadd.f32 %v492_v25, %v464_v60 }
 0x4b3   :  { %2400 = vtanh.f32 %v494_v26 }
 0x4c0   :  { %v2401_v27 = vpop.eup %2400 }
 0x4c1   :  { %v496_v28 = vsub.f32 0.0, %v2401_v27 }
 0x4c3   :  { %498 = vrot.lane.b32.xlu1 %v496_v28, %s2633_s29 }
 0x501   :  { %v609_v29 = vpop.permute.xlu0 %608 }
 0x502   :  { %v611_v30 = vadd.f32 %v609_v29, %v231_v15 }
 0x504   :  { %2402 = vtanh.f32 %v611_v30 }
 0x511   :  { %v2403_v31 = vpop.eup %2402 }
 0x512   :  { %v613_v33 = vsub.f32 %v2799_v42, %v2403_v31 }
 0x514   :  { %615 = vrot.lane.b32.xlu0 %v613_v33, %s2633_s29 }
 0x535   :  { %v499_v34 = vpop.permute.xlu1 %498 }
 0x536   :  { %v501_v36 = vmul.f32 %v2395_v13, %v499_v34 }
 0x538   :  { %503 = vrot.lane.b32.xlu1 %v501_v36, %s2634_s30 }
 0x586   :  { %v616_v38 = vpop.permute.xlu0 %615 }
 0x587   :  { %v618_v40 = vmul.f32 %v2399_v22, %v616_v38 }
 0x589   :  { %620 = vrot.lane.b32.xlu0 %v618_v40, %s2634_s30 }
 0x5aa   :  { %v504_v41 = vpop.permute.xlu1 %503 }
 0x5ab   :  { %v2848_v43 = vadd.f32 %v2401_v27, %v504_v41 }
 0x5ad   :  { %v547_v45 = vpack.c.bf16 %v2848_v43, %v2848_v43 }
 0x5af   :  { %549 = vrot.lane.b32.xlu1 %v547_v45, %s2626_s26 }
 0x5fb   :  { %v621_v46 = vpop.permute.xlu0 %620 }
 0x5fc   :  { %v2853_v42 = vadd.f32 %v2403_v31, %v621_v46 }
 0x5fe   :  { %v624_v47 = vpack.c.bf16 %v2853_v42, %v2853_v42 }
 0x600   :  { %626 = vrot.lane.b32.xlu0 %v624_v47, %s2626_s26 }
 0x621   :  { %v550_v48 = vpop.permute.xlu1 %549 }
 0x622   :  { %2192 = vmatmul.mubr.msk.bf16.vlgmr.msra.gmra.mxu1 %vm270_vm2, %v550_v48 }
 0x623   :  { %2204 = vmatpush3.bf16.msra.mxu1 %v2734_v2  ;;  %2207 = vmatprep.mubr.msk.bf16.mxu1 %vm2631_vm0, %v2630_v0 }
 0x624   :  { %2205 = vmatprep.subr.bf16.mxu1 %v2630_v0 }
 0x627   :  { %2206 = vmatpush3.bf16.msra.mxu1 %v2740_v4 }
 0x628   :  { %2219 = vmatprep.subr.bf16.mxu1 %v2630_v0 }
 0x672   :  { %v627_v49 = vpop.permute.xlu0 %626 }
 0x673   :  { %2200 = vmatmul.mubr.msk.bf16.vlgmr.msra.gmra.mxu0 %vm270_vm2, %v627_v49  ;;  %2208 = vmatmul.mubr.msk.bf16.vlgmr.msra.gmra.mxu1 %vm270_vm2, %v627_v49 }
 0x674   :  { %2212 = vmatpush3.bf16.msra.mxu0 %v2772_v32  ;;  %2215 = vmatprep.mubr.msk.bf16.mxu0 %vm2631_vm0, %v2630_v0 }
 0x675   :  { %2213 = vmatprep.subr.bf16.mxu0 %v2630_v0  ;;  %2220 = vmatpush3.bf16.msra.mxu1 %v2783_v37 }
 0x676   :  { %2221 = vmatprep.subr.bf16.mxu1 %v2630_v0  ;;  %2223 = vmatprep.mubr.msk.bf16.mxu1 %vm2631_vm0, %v2630_v0 }
 0x678   :  { %2214 = vmatpush3.bf16.msra.mxu0 %v2775_v35 }
 0x679   :  { %2227 = vmatprep.subr.bf16.mxu0 %v2630_v0  ;;  %2222 = vmatpush3.bf16.msra.mxu1 %v2788_v39 }
 0x67a   :  { %2235 = vmatprep.subr.bf16.mxu1 %v2630_v0 }
 0x6e2   :  { %v588_v50 = vpop.f32.mrf.mxu1 }
 0x6e3   :  { %v678_v52 = vadd.f32 %v588_v50, %v2804_v44 }
 0x6e4   :  { %v2193_v58 = vpop.f32.mrf.mxu1 }
 0x6e5   :  { %680 = vrot.lane.b32.xlu1 %v678_v52, %s2626_s26 }
 0x6e6   :  { %v591_v59 = vpop.f32.mrf.mxu1 }
 0x6e8   :  { %v2194_v60 = vpop.f32.mrf.mxu1 }
 0x733   :  { %v665_v61 = vpop.f32.mrf.mxu0  ;;  %v735_v62 = vpop.f32.mrf.mxu1 }
 0x734   :  { %v666_v63 = vadd.f32 %v2835_v57, %v665_v61  ;;  %v795_v1 = vadd.f32 %v735_v62, %v2758_v11  ;;  %v788_v21 = vadd.f32 %v735_v62, %v236_v20 }
 0x735   :  { %v2201_v3 = vpop.f32.mrf.mxu0  ;;  %v2209_v5 = vpop.f32.mrf.mxu1 }
 0x736   :  { %v671_v6 = vadd.f32 %v666_v63, %v588_v50  ;;  %797 = vrot.lane.b32.xlu0 %v795_v1, %s2626_s26  ;;  %v2024_v22 = vmul.f32 -1.442695, %v788_v21 }
 0x737   :  { %v668_v7 = vpop.f32.mrf.mxu0  ;;  %v738_v8 = vpop.f32.mrf.mxu1 }
 0x738   :  { %v2021_v9 = vmul.f32 -1.442695, %v671_v6 }
 0x739   :  { %v2202_v10 = vpop.f32.mrf.mxu0  ;;  %v2210_v12 = vpop.f32.mrf.mxu1 }
 0x73a   :  { %2404 = vpow2.f32 %v2021_v9 }
 0x747   :  { %v2405_v13 = vpop.eup %2404 }
 0x748   :  { %v675_v14 = vadd.f32 1.0, %v2405_v13 }
 0x74a   :  { %2406 = vrcp.f32 %v675_v14 }
 0x74b   :  { %2408 = vpow2.f32 %v2024_v22  ;;  %v239_v22 = vadd.f32 %v2822_v51, %v2767_v18 }
 0x757   :  { %v2407_v15 = vpop.eup %2406  ;;  %v681_v16 = vpop.permute.xlu1 %680 }
 0x758   :  { %v683_v19 = vmul.f32 %v2407_v15, %v681_v16  ;;  %v2409_v23 = vpop.eup %2408 }
 0x759   :  { %v792_v24 = vadd.f32 1.0, %v2409_v23 }
 0x75a   :  { %685 = vrot.lane.b32.xlu1 %v683_v19, %s2626_s26 }
 0x75b   :  { %2410 = vrcp.f32 %v792_v24 }
 0x768   :  { %v2411_v25 = vpop.eup %2410 }
 0x7a8   :  { %v798_v26 = vpop.permute.xlu0 %797 }
 0x7a9   :  { %v800_v27 = vmul.f32 %v2411_v25, %v798_v26 }
 0x7ab   :  { %802 = vrot.lane.b32.xlu0 %v800_v27, %s2626_s26 }
 0x7cc   :  { %v686_v28 = vpop.permute.xlu1 %685 }
 0x7cd   :  { %v688_v29 = vadd.f32 %v686_v28, %v666_v63 }
 0x7cf   :  { %2412 = vtanh.f32 %v688_v29 }
 0x7dc   :  { %v2413_v30 = vpop.eup %2412 }
 0x7dd   :  { %v690_v31 = vsub.f32 %v2848_v43, %v2413_v30 }
 0x7df   :  { %692 = vrot.lane.b32.xlu1 %v690_v31, %s2633_s29 }
 0x81d   :  { %v803_v17 = vpop.permute.xlu0 %802 }
 0x81e   :  { %v805_v33 = vadd.f32 %v803_v17, %v236_v20 }
 0x820   :  { %2414 = vtanh.f32 %v805_v33 }
 0x82d   :  { %v2415_v34 = vpop.eup %2414 }
 0x82e   :  { %v807_v36 = vsub.f32 %v2853_v42, %v2415_v34 }
 0x830   :  { %809 = vrot.lane.b32.xlu0 %v807_v36, %s2633_s29 }
 0x851   :  { %v693_v38 = vpop.permute.xlu1 %692 }
 0x852   :  { %v695_v40 = vmul.f32 %v2407_v15, %v693_v38 }
 0x854   :  { %697 = vrot.lane.b32.xlu1 %v695_v40, %s2634_s30 }
 0x8a2   :  { %v810_v41 = vpop.permute.xlu0 %809 }
 0x8a3   :  { %v812_v45 = vmul.f32 %v2411_v25, %v810_v41 }
 0x8a5   :  { %814 = vrot.lane.b32.xlu0 %v812_v45, %s2634_s30 }
 0x8c6   :  { %v698_v46 = vpop.permute.xlu1 %697 }
 0x8c7   :  { %v2894_v43 = vadd.f32 %v2413_v30, %v698_v46 }
 0x8c9   :  { %v741_v47 = vpack.c.bf16 %v2894_v43, %v2894_v43 }
 0x8cb   :  { %743 = vrot.lane.b32.xlu1 %v741_v47, %s2626_s26 }
 0x917   :  { %v815_v48 = vpop.permute.xlu0 %814 }
 0x918   :  { %v2899_v42 = vadd.f32 %v2415_v34, %v815_v48 }
 0x91a   :  { %v818_v49 = vpack.c.bf16 %v2899_v42, %v2899_v42 }
 0x91c   :  { %820 = vrot.lane.b32.xlu0 %v818_v49, %s2626_s26 }
 0x93d   :  { %v744_v50 = vpop.permute.xlu1 %743 }
 0x93e   :  { %2216 = vmatmul.mubr.msk.bf16.vlgmr.msra.gmra.mxu0 %vm270_vm2, %v744_v50 }
 0x93f   :  { %2228 = vmatpush3.bf16.msra.mxu0 %v2734_v2  ;;  %2231 = vmatprep.mubr.msk.bf16.mxu0 %vm2631_vm0, %v2630_v0 }
 0x940   :  { %2229 = vmatprep.subr.bf16.mxu0 %v2630_v0 }
 0x943   :  { %2230 = vmatpush3.bf16.msra.mxu0 %v2740_v4 }
 0x944   :  { %2243 = vmatprep.subr.bf16.mxu0 %v2630_v0 }
 0x98e   :  { %v821_v52 = vpop.permute.xlu0 %820 }
 0x98f   :  { %2224 = vmatmul.mubr.msk.bf16.vlgmr.msra.gmra.mxu1 %vm270_vm2, %v821_v52  ;;  %2232 = vmatmul.mubr.msk.bf16.vlgmr.msra.gmra.mxu0 %vm270_vm2, %v821_v52 }
 0x990   :  { %2236 = vmatpush3.bf16.msra.mxu1 %v2772_v32  ;;  %2239 = vmatprep.mubr.msk.bf16.mxu1 %vm2631_vm0, %v2630_v0 }
 0x991   :  { %2237 = vmatprep.subr.bf16.mxu1 %v2630_v0  ;;  %2244 = vmatpush3.bf16.msra.mxu0 %v2783_v37 }
 0x992   :  { %2245 = vmatprep.subr.bf16.mxu0 %v2630_v0  ;;  %2247 = vmatprep.mubr.msk.bf16.mxu0 %vm2631_vm0, %v2630_v0 }
 0x994   :  { %2238 = vmatpush3.bf16.msra.mxu1 %v2775_v35 }
 0x995   :  { %2251 = vmatprep.subr.bf16.mxu1 %v2630_v0  ;;  %2246 = vmatpush3.bf16.msra.mxu0 %v2788_v39 }
 0x996   :  { %2259 = vmatprep.subr.bf16.mxu0 %v2630_v0 }
 0x9fe   :  { %v782_v58 = vpop.f32.mrf.mxu0 }
 0x9ff   :  { %v872_v59 = vadd.f32 %v782_v58, %v2804_v44 }
 0xa00   :  { %v2217_v60 = vpop.f32.mrf.mxu0 }
 0xa01   :  { %874 = vrot.lane.b32.xlu1 %v872_v59, %s2626_s26 }
 0xa02   :  { %v785_v61 = vpop.f32.mrf.mxu0 }
 0xa04   :  { %v2218_v62 = vpop.f32.mrf.mxu0 }
 0xa4f   :  { %v859_v63 = vpop.f32.mrf.mxu1  ;;  %v929_v1 = vpop.f32.mrf.mxu0 }
 0xa50   :  { %v860_v3 = vadd.f32 %v2835_v57, %v859_v63  ;;  %v989_v5 = vadd.f32 %v929_v1, %v2758_v11  ;;  %v982_v23 = vadd.f32 %v929_v1, %v239_v22 }
 0xa51   :  { %v2225_v6 = vpop.f32.mrf.mxu1  ;;  %v2233_v7 = vpop.f32.mrf.mxu0 }
 0xa52   :  { %v865_v8 = vadd.f32 %v860_v3, %v782_v58  ;;  %991 = vrot.lane.b32.xlu0 %v989_v5, %s2626_s26  ;;  %v2029_v24 = vmul.f32 -1.442695, %v982_v23  ;;  %v244_v23 = vadd.f32 %v2767_v18, %v2826_v54 }
 0xa53   :  { %v862_v9 = vpop.f32.mrf.mxu1  ;;  %v932_v10 = vpop.f32.mrf.mxu0 }
 0xa54   :  { %v2026_v12 = vmul.f32 -1.442695, %v865_v8 }
 0xa55   :  { %v2226_v13 = vpop.f32.mrf.mxu1  ;;  %v2234_v14 = vpop.f32.mrf.mxu0 }
 0xa56   :  { %2416 = vpow2.f32 %v2026_v12 }
 0xa63   :  { %v2417_v15 = vpop.eup %2416 }
 0xa64   :  { %v869_v16 = vadd.f32 1.0, %v2417_v15 }
 0xa66   :  { %2418 = vrcp.f32 %v869_v16 }
 0xa67   :  { %2420 = vpow2.f32 %v2029_v24 }
 0xa73   :  { %v2419_v19 = vpop.eup %2418  ;;  %v875_v20 = vpop.permute.xlu1 %874 }
 0xa74   :  { %v877_v21 = vmul.f32 %v2419_v19, %v875_v20  ;;  %v2421_v25 = vpop.eup %2420 }
 0xa75   :  { %v986_v26 = vadd.f32 1.0, %v2421_v25 }
 0xa76   :  { %879 = vrot.lane.b32.xlu1 %v877_v21, %s2626_s26 }
 0xa77   :  { %2422 = vrcp.f32 %v986_v26 }
 0xa84   :  { %v2423_v27 = vpop.eup %2422 }
 0xac4   :  { %v992_v28 = vpop.permute.xlu0 %991 }
 0xac5   :  { %v994_v29 = vmul.f32 %v2423_v27, %v992_v28 }
 0xac7   :  { %996 = vrot.lane.b32.xlu0 %v994_v29, %s2626_s26 }
 0xae8   :  { %v880_v30 = vpop.permute.xlu1 %879 }
 0xae9   :  { %v882_v31 = vadd.f32 %v880_v30, %v860_v3 }
 0xaeb   :  { %2424 = vtanh.f32 %v882_v31 }
 0xaf8   :  { %v2425_v17 = vpop.eup %2424 }
 0xaf9   :  { %v884_v33 = vsub.f32 %v2894_v43, %v2425_v17 }
 0xafb   :  { %886 = vrot.lane.b32.xlu1 %v884_v33, %s2633_s29 }
 0xb39   :  { %v997_v51 = vpop.permute.xlu0 %996 }
 0xb3a   :  { %v999_v34 = vadd.f32 %v997_v51, %v239_v22 }
 0xb3c   :  { %2426 = vtanh.f32 %v999_v34 }
 0xb49   :  { %v2427_v36 = vpop.eup %2426 }
 0xb4a   :  { %v1001_v38 = vsub.f32 %v2899_v42, %v2427_v36 }
 0xb4c   :  { %1003 = vrot.lane.b32.xlu0 %v1001_v38, %s2633_s29 }
 0xb6d   :  { %v887_v40 = vpop.permute.xlu1 %886 }
 0xb6e   :  { %v889_v41 = vmul.f32 %v2419_v19, %v887_v40 }
 0xb70   :  { %891 = vrot.lane.b32.xlu1 %v889_v41, %s2634_s30 }
 0xbbe   :  { %v1004_v45 = vpop.permute.xlu0 %1003 }
 0xbbf   :  { %v1006_v46 = vmul.f32 %v2423_v27, %v1004_v45 }
 0xbc1   :  { %1008 = vrot.lane.b32.xlu0 %v1006_v46, %s2634_s30 }
 0xbe2   :  { %v892_v47 = vpop.permute.xlu1 %891 }
 0xbe3   :  { %v2940_v43 = vadd.f32 %v2425_v17, %v892_v47 }
 0xbe5   :  { %v935_v48 = vpack.c.bf16 %v2940_v43, %v2940_v43 }
 0xbe7   :  { %937 = vrot.lane.b32.xlu1 %v935_v48, %s2626_s26 }
 0xc33   :  { %v1009_v49 = vpop.permute.xlu0 %1008 }
 0xc34   :  { %v2945_v42 = vadd.f32 %v2427_v36, %v1009_v49 }
 0xc36   :  { %v1012_v50 = vpack.c.bf16 %v2945_v42, %v2945_v42 }
 0xc38   :  { %1014 = vrot.lane.b32.xlu0 %v1012_v50, %s2626_s26 }
 0xc59   :  { %v938_v52 = vpop.permute.xlu1 %937 }
 0xc5a   :  { %2240 = vmatmul.mubr.msk.bf16.vlgmr.msra.gmra.mxu1 %vm270_vm2, %v938_v52 }
 0xc5b   :  { %2252 = vmatpush3.bf16.msra.mxu1 %v2734_v2  ;;  %2255 = vmatprep.mubr.msk.bf16.mxu1 %vm2631_vm0, %v2630_v0 }
 0xc5c   :  { %2253 = vmatprep.subr.bf16.mxu1 %v2630_v0 }
 0xc5f   :  { %2254 = vmatpush3.bf16.msra.mxu1 %v2740_v4 }
 0xc60   :  { %2267 = vmatprep.subr.bf16.mxu1 %v2630_v0 }
 0xcaa   :  { %v1015_v58 = vpop.permute.xlu0 %1014 }
 0xcab   :  { %2248 = vmatmul.mubr.msk.bf16.vlgmr.msra.gmra.mxu0 %vm270_vm2, %v1015_v58  ;;  %2256 = vmatmul.mubr.msk.bf16.vlgmr.msra.gmra.mxu1 %vm270_vm2, %v1015_v58 }
 0xcac   :  { %2260 = vmatpush3.bf16.msra.mxu0 %v2772_v32  ;;  %2263 = vmatprep.mubr.msk.bf16.mxu0 %vm2631_vm0, %v2630_v0 }
 0xcad   :  { %2261 = vmatprep.subr.bf16.mxu0 %v2630_v0  ;;  %2268 = vmatpush3.bf16.msra.mxu1 %v2783_v37 }
 0xcae   :  { %2269 = vmatprep.subr.bf16.mxu1 %v2630_v0  ;;  %2271 = vmatprep.mubr.msk.bf16.mxu1 %vm2631_vm0, %v2630_v0 }
 0xcb0   :  { %2262 = vmatpush3.bf16.msra.mxu0 %v2775_v35 }
 0xcb1   :  { %2275 = vmatprep.subr.bf16.mxu0 %v2630_v0  ;;  %2270 = vmatpush3.bf16.msra.mxu1 %v2788_v39 }
 0xcb2   :  { %2283 = vmatprep.subr.bf16.mxu1 %v2630_v0 }
 0xd1a   :  { %v976_v59 = vpop.f32.mrf.mxu1 }
 0xd1b   :  { %v1066_v60 = vadd.f32 %v976_v59, %v2804_v44 }
 0xd1c   :  { %v2241_v61 = vpop.f32.mrf.mxu1 }
 0xd1d   :  { %1068 = vrot.lane.b32.xlu1 %v1066_v60, %s2626_s26 }
 0xd1e   :  { %v979_v62 = vpop.f32.mrf.mxu1 }
 0xd20   :  { %v2242_v63 = vpop.f32.mrf.mxu1 }
 0xd6b   :  { %v1053_v1 = vpop.f32.mrf.mxu0  ;;  %v1123_v3 = vpop.f32.mrf.mxu1 }
 0xd6c   :  { %v1054_v5 = vadd.f32 %v2835_v57, %v1053_v1  ;;  %v1183_v6 = vadd.f32 %v1123_v3, %v2758_v11  ;;  %v1176_v24 = vadd.f32 %v1123_v3, %v244_v23 }
 0xd6d   :  { %v2249_v7 = vpop.f32.mrf.mxu0  ;;  %v2257_v8 = vpop.f32.mrf.mxu1 }
 0xd6e   :  { %v1059_v9 = vadd.f32 %v1054_v5, %v976_v59  ;;  %1185 = vrot.lane.b32.xlu0 %v1183_v6, %s2626_s26  ;;  %v2034_v25 = vmul.f32 -1.442695, %v1176_v24 }
 0xd6f   :  { %v1056_v10 = vpop.f32.mrf.mxu0  ;;  %v1126_v12 = vpop.f32.mrf.mxu1 }
 0xd70   :  { %v2031_v13 = vmul.f32 -1.442695, %v1059_v9 }
 0xd71   :  { %v2250_v14 = vpop.f32.mrf.mxu0  ;;  %v2258_v15 = vpop.f32.mrf.mxu1 }
 0xd72   :  { %2428 = vpow2.f32 %v2031_v13 }
 0xd7f   :  { %v2429_v16 = vpop.eup %2428 }
 0xd80   :  { %v1063_v19 = vadd.f32 1.0, %v2429_v16 }
 0xd82   :  { %2430 = vrcp.f32 %v1063_v19 }
 0xd83   :  { %2432 = vpow2.f32 %v2034_v25 }
 0xd8f   :  { %v2431_v20 = vpop.eup %2430  ;;  %v1069_v21 = vpop.permute.xlu1 %1068 }
 0xd90   :  { %v1071_v22 = vmul.f32 %v2431_v20, %v1069_v21  ;;  %v2433_v26 = vpop.eup %2432  ;;  %v247_v21 = vadd.f32 %v2767_v18, %v2830_v56 }
 0xd91   :  { %v1180_v27 = vadd.f32 1.0, %v2433_v26 }
 0xd92   :  { %1073 = vrot.lane.b32.xlu1 %v1071_v22, %s2626_s26 }
 0xd93   :  { %2434 = vrcp.f32 %v1180_v27 }
 0xda0   :  { %v2435_v28 = vpop.eup %2434 }
 0xde0   :  { %v1186_v29 = vpop.permute.xlu0 %1185 }
 0xde1   :  { %v1188_v30 = vmul.f32 %v2435_v28, %v1186_v29 }
 0xde3   :  { %1190 = vrot.lane.b32.xlu0 %v1188_v30, %s2626_s26 }
 0xe04   :  { %v1074_v31 = vpop.permute.xlu1 %1073 }
 0xe05   :  { %v1076_v17 = vadd.f32 %v1074_v31, %v1054_v5 }
 0xe07   :  { %2436 = vtanh.f32 %v1076_v17 }
 0xe14   :  { %v2437_v33 = vpop.eup %2436 }
 0xe15   :  { %v1078_v51 = vsub.f32 %v2940_v43, %v2437_v33 }
 0xe17   :  { %1080 = vrot.lane.b32.xlu1 %v1078_v51, %s2633_s29 }
 0xe55   :  { %v1191_v54 = vpop.permute.xlu0 %1190 }
 0xe56   :  { %v1193_v34 = vadd.f32 %v1191_v54, %v244_v23 }
 0xe58   :  { %2438 = vtanh.f32 %v1193_v34 }
 0xe65   :  { %v2439_v36 = vpop.eup %2438 }
 0xe66   :  { %v1195_v38 = vsub.f32 %v2945_v42, %v2439_v36 }
 0xe68   :  { %1197 = vrot.lane.b32.xlu0 %v1195_v38, %s2633_s29 }
 0xe89   :  { %v1081_v40 = vpop.permute.xlu1 %1080 }
 0xe8a   :  { %v1083_v41 = vmul.f32 %v2431_v20, %v1081_v40 }
 0xe8c   :  { %1085 = vrot.lane.b32.xlu1 %v1083_v41, %s2634_s30 }
 0xeda   :  { %v1198_v45 = vpop.permute.xlu0 %1197 }
 0xedb   :  { %v1200_v46 = vmul.f32 %v2435_v28, %v1198_v45 }
 0xedd   :  { %1202 = vrot.lane.b32.xlu0 %v1200_v46, %s2634_s30 }
 0xefe   :  { %v1086_v47 = vpop.permute.xlu1 %1085 }
 0xeff   :  { %v2986_v43 = vadd.f32 %v2437_v33, %v1086_v47 }
 0xf01   :  { %v1129_v48 = vpack.c.bf16 %v2986_v43, %v2986_v43 }
 0xf03   :  { %1131 = vrot.lane.b32.xlu1 %v1129_v48, %s2626_s26 }
 0xf4f   :  { %v1203_v49 = vpop.permute.xlu0 %1202 }
 0xf50   :  { %v2991_v42 = vadd.f32 %v2439_v36, %v1203_v49  ;;  %v3046_v49 = vld [vmem:[%s3175_s2 + $0x8] sm:$0xff]  }
 0xf52   :  { %v1206_v50 = vpack.c.bf16 %v2991_v42, %v2991_v42 }
 0xf54   :  { %1208 = vrot.lane.b32.xlu0 %v1206_v50, %s2626_s26 }
 0xf75   :  { %v1132_v52 = vpop.permute.xlu1 %1131 }
 0xf76   :  { %2264 = vmatmul.mubr.msk.bf16.vlgmr.msra.gmra.mxu0 %vm270_vm2, %v1132_v52 }
 0xf77   :  { %2276 = vmatpush3.bf16.msra.mxu0 %v2734_v2  ;;  %2279 = vmatprep.mubr.msk.bf16.mxu0 %vm2631_vm0, %v2630_v0 }
 0xf78   :  { %2277 = vmatprep.subr.bf16.mxu0 %v2630_v0 }
 0xf7b   :  { %2278 = vmatpush3.bf16.msra.mxu0 %v2740_v4 }
 0xf7c   :  { %2291 = vmatprep.subr.bf16.mxu0 %v2630_v0 }
 0xfc6   :  { %v1209_v58 = vpop.permute.xlu0 %1208 }
 0xfc7   :  { %2272 = vmatmul.mubr.msk.bf16.vlgmr.msra.gmra.mxu1 %vm270_vm2, %v1209_v58  ;;  %2280 = vmatmul.mubr.msk.bf16.vlgmr.msra.gmra.mxu0 %vm270_vm2, %v1209_v58 }
 0xfc8   :  { %2284 = vmatpush3.bf16.msra.mxu1 %v2772_v32  ;;  %2287 = vmatprep.mubr.msk.bf16.mxu1 %vm2631_vm0, %v2630_v0 }
 0xfc9   :  { %2285 = vmatprep.subr.bf16.mxu1 %v2630_v0  ;;  %2292 = vmatpush3.bf16.msra.mxu0 %v2783_v37 }
 0xfca   :  { %2293 = vmatprep.subr.bf16.mxu0 %v2630_v0  ;;  %2295 = vmatprep.mubr.msk.bf16.mxu0 %vm2631_vm0, %v2630_v0 }
 0xfcc   :  { %2286 = vmatpush3.bf16.msra.mxu1 %v2775_v35 }
 0xfcd   :  { %2299 = vmatprep.subr.bf16.mxu1 %v2630_v0  ;;  %2294 = vmatpush3.bf16.msra.mxu0 %v2788_v39 }
 0xfce   :  { %2307 = vmatprep.subr.bf16.mxu0 %v2630_v0 }
0x1036   :  { %v1170_v2 = vpop.f32.mrf.mxu0 }
0x1037   :  { %v1260_v4 = vadd.f32 %v1170_v2, %v2804_v44 }
0x1038   :  { %v2265_v59 = vpop.f32.mrf.mxu0 }
0x1039   :  { %1262 = vrot.lane.b32.xlu1 %v1260_v4, %s2626_s26 }
0x103a   :  { %v1173_v60 = vpop.f32.mrf.mxu0 }
0x103c   :  { %v2266_v61 = vpop.f32.mrf.mxu0 }
0x1087   :  { %v1247_v62 = vpop.f32.mrf.mxu1  ;;  %v1317_v63 = vpop.f32.mrf.mxu0 }
0x1088   :  { %v1248_v1 = vadd.f32 %v2835_v57, %v1247_v62  ;;  %v1377_v3 = vadd.f32 %v1317_v63, %v2758_v11  ;;  %v1370_v22 = vadd.f32 %v1317_v63, %v247_v21 }
0x1089   :  { %v2273_v5 = vpop.f32.mrf.mxu1  ;;  %v2281_v6 = vpop.f32.mrf.mxu0 }
0x108a   :  { %v1253_v7 = vadd.f32 %v1248_v1, %v1170_v2  ;;  %1379 = vrot.lane.b32.xlu0 %v1377_v3, %s2626_s26  ;;  %v2039_v23 = vmul.f32 -1.442695, %v1370_v22 }
0x108b   :  { %v1250_v8 = vpop.f32.mrf.mxu1  ;;  %v1320_v9 = vpop.f32.mrf.mxu0 }
0x108c   :  { %v2036_v10 = vmul.f32 -1.442695, %v1253_v7 }
0x108d   :  { %v2274_v12 = vpop.f32.mrf.mxu1  ;;  %v2282_v13 = vpop.f32.mrf.mxu0 }
0x108e   :  { %2440 = vpow2.f32 %v2036_v10  ;;  %v3082_v13 = vld [vmem:[%s3176_s3] ss:$0 sm:$0xff] }
0x109b   :  { %v2441_v14 = vpop.eup %2440 }
0x109c   :  { %v1257_v15 = vadd.f32 1.0, %v2441_v14  ;;  %v252_v14 = vadd.f32 %v3082_v13, %v2824_v53 }
0x109e   :  { %2442 = vrcp.f32 %v1257_v15 }
0x109f   :  { %2444 = vpow2.f32 %v2039_v23 }
0x10ab   :  { %v2443_v16 = vpop.eup %2442  ;;  %v1263_v19 = vpop.permute.xlu1 %1262 }
0x10ac   :  { %v1265_v20 = vmul.f32 %v2443_v16, %v1263_v19  ;;  %v2445_v24 = vpop.eup %2444 }
0x10ad   :  { %v1374_v25 = vadd.f32 1.0, %v2445_v24 }
0x10ae   :  { %1267 = vrot.lane.b32.xlu1 %v1265_v20, %s2626_s26 }
0x10af   :  { %2446 = vrcp.f32 %v1374_v25 }
0x10bc   :  { %v2447_v26 = vpop.eup %2446 }
0x10fc   :  { %v1380_v27 = vpop.permute.xlu0 %1379 }
0x10fd   :  { %v1382_v28 = vmul.f32 %v2447_v26, %v1380_v27 }
0x10ff   :  { %1384 = vrot.lane.b32.xlu0 %v1382_v28, %s2626_s26 }
0x1120   :  { %v1268_v29 = vpop.permute.xlu1 %1267 }
0x1121   :  { %v1270_v30 = vadd.f32 %v1268_v29, %v1248_v1 }
0x1123   :  { %2448 = vtanh.f32 %v1270_v30 }
0x1130   :  { %v2449_v31 = vpop.eup %2448 }
0x1131   :  { %v1272_v17 = vsub.f32 %v2986_v43, %v2449_v31 }
0x1133   :  { %1274 = vrot.lane.b32.xlu1 %v1272_v17, %s2633_s29 }
0x1171   :  { %v1385_v18 = vpop.permute.xlu0 %1384 }
0x1172   :  { %v1387_v56 = vadd.f32 %v1385_v18, %v247_v21 }
0x1174   :  { %2450 = vtanh.f32 %v1387_v56 }
0x1181   :  { %v2451_v33 = vpop.eup %2450 }
0x1182   :  { %v1389_v51 = vsub.f32 %v2991_v42, %v2451_v33  ;;  %v3055_v42 = vld [vmem:[%s3175_s2] sm:$0xff]  }
0x1184   :  { %1391 = vrot.lane.b32.xlu0 %v1389_v51, %s2633_s29 }
0x11a5   :  { %v1275_v54 = vpop.permute.xlu1 %1274 }
0x11a6   :  { %v1277_v34 = vmul.f32 %v2443_v16, %v1275_v54 }
0x11a8   :  { %1279 = vrot.lane.b32.xlu1 %v1277_v34, %s2634_s30 }
0x11f6   :  { %v1392_v36 = vpop.permute.xlu0 %1391 }
0x11f7   :  { %v1394_v38 = vmul.f32 %v2447_v26, %v1392_v36 }
0x11f9   :  { %1396 = vrot.lane.b32.xlu0 %v1394_v38, %s2634_s30 }
0x121a   :  { %v1280_v40 = vpop.permute.xlu1 %1279 }
0x121b   :  { %v3032_v41 = vadd.f32 %v2449_v31, %v1280_v40 }
0x121d   :  { %v1323_v45 = vpack.c.bf16 %v3032_v41, %v3032_v41 }
0x121f   :  { %1325 = vrot.lane.b32.xlu1 %v1323_v45, %s2626_s26  ;;  %v2489_v45 = vld [vmem:[#allocation8 + $0x8] sm:$0xff]  }
0x126b   :  { %v1397_v46 = vpop.permute.xlu0 %1396 }
0x126c   :  { %v3037_v47 = vadd.f32 %v2451_v33, %v1397_v46  ;;  %v2490_v46 = vld [vmem:[#allocation7 + $0x8] sm:$0xff]  }
0x126e   :  { %v1400_v43 = vpack.c.bf16 %v3037_v47, %v3037_v47 }
0x1270   :  { %1402 = vrot.lane.b32.xlu0 %v1400_v43, %s2626_s26  ;;  %v2492_v43 = vld [vmem:[#allocation7] sm:$0xff]  }
0x1291   :  { %v1326_v48 = vpop.permute.xlu1 %1325 }
0x1292   :  { %2288 = vmatmul.mubr.msk.bf16.vlgmr.msra.gmra.mxu1 %vm270_vm2, %v1326_v48 }
0x1293   :  { %2300 = vmatpush3.bf16.msra.mxu1 %v3046_v49  ;;  %2303 = vmatprep.mubr.msk.bf16.mxu1 %vm2631_vm0, %v2630_v0 }
0x1294   :  { %2301 = vmatprep.subr.bf16.mxu1 %v2630_v0 }
0x1297   :  { %2302 = vmatpush3.bf16.msra.mxu1 %v3055_v42 }
0x1298   :  { %2315 = vmatprep.subr.bf16.mxu1 %v2630_v0 }
0x12e2   :  { %v1403_v50 = vpop.permute.xlu0 %1402 }
0x12e3   :  { %2296 = vmatmul.mubr.msk.bf16.vlgmr.msra.gmra.mxu0 %vm270_vm2, %v1403_v50  ;;  %2304 = vmatmul.mubr.msk.bf16.vlgmr.msra.gmra.mxu1 %vm270_vm2, %v1403_v50 }
0x12e4   :  { %2308 = vmatpush3.bf16.msra.mxu0 %v2772_v32  ;;  %2311 = vmatprep.mubr.msk.bf16.mxu0 %vm2631_vm0, %v2630_v0 }
0x12e5   :  { %2309 = vmatprep.subr.bf16.mxu0 %v2630_v0  ;;  %2316 = vmatpush3.bf16.msra.mxu1 %v2783_v37 }
0x12e6   :  { %2317 = vmatprep.subr.bf16.mxu1 %v2630_v0  ;;  %2319 = vmatprep.mubr.msk.bf16.mxu1 %vm2631_vm0, %v2630_v0 }
0x12e8   :  { %2310 = vmatpush3.bf16.msra.mxu0 %v2775_v35 }
0x12e9   :  { %2323 = vmatprep.subr.bf16.mxu0 %v2630_v0  ;;  %2318 = vmatpush3.bf16.msra.mxu1 %v2788_v39 }
0x12ea   :  { %2331 = vmatprep.subr.bf16.mxu1 %v2630_v0 }
0x1352   :  { %v1364_v32 = vpop.f32.mrf.mxu1 }
0x1353   :  { %v1454_v52 = vadd.f32 %v1364_v32, %v2804_v44 }
0x1354   :  { %v2289_v58 = vpop.f32.mrf.mxu1 }
0x1355   :  { %1456 = vrot.lane.b32.xlu1 %v1454_v52, %s2626_s26 }
0x1356   :  { %v1367_v37 = vpop.f32.mrf.mxu1 }
0x1358   :  { %v2290_v2 = vpop.f32.mrf.mxu1 }
0x13a3   :  { %v1441_v4 = vpop.f32.mrf.mxu0  ;;  %v1511_v59 = vpop.f32.mrf.mxu1 }
0x13a4   :  { %v1442_v60 = vadd.f32 %v2835_v57, %v1441_v4  ;;  %v1571_v35 = vadd.f32 %v1511_v59, %v2758_v11  ;;  %v1564_v15 = vadd.f32 %v1511_v59, %v252_v14 }
0x13a5   :  { %v2297_v61 = vpop.f32.mrf.mxu0  ;;  %v2305_v62 = vpop.f32.mrf.mxu1 }
0x13a6   :  { %v1447_v63 = vadd.f32 %v1442_v60, %v1364_v32  ;;  %1573 = vrot.lane.b32.xlu0 %v1571_v35, %s2626_s26  ;;  %v2044_v16 = vmul.f32 -1.442695, %v1564_v15 }
0x13a7   :  { %v1444_v39 = vpop.f32.mrf.mxu0  ;;  %v1514_v1 = vpop.f32.mrf.mxu1 }
0x13a8   :  { %v2041_v3 = vmul.f32 -1.442695, %v1447_v63 }
0x13a9   :  { %v2298_v5 = vpop.f32.mrf.mxu0  ;;  %v2306_v6 = vpop.f32.mrf.mxu1 }
0x13aa   :  { %2452 = vpow2.f32 %v2041_v3 }
0x13b7   :  { %v2453_v7 = vpop.eup %2452 }
0x13b8   :  { %v1451_v8 = vadd.f32 1.0, %v2453_v7 }
0x13ba   :  { %2454 = vrcp.f32 %v1451_v8 }
0x13bb   :  { %2456 = vpow2.f32 %v2044_v16 }
0x13c7   :  { %v2455_v9 = vpop.eup %2454  ;;  %v1457_v10 = vpop.permute.xlu1 %1456 }
0x13c8   :  { %v1459_v12 = vmul.f32 %v2455_v9, %v1457_v10  ;;  %v2457_v19 = vpop.eup %2456 }
0x13c9   :  { %v1568_v20 = vadd.f32 1.0, %v2457_v19 }
0x13ca   :  { %1461 = vrot.lane.b32.xlu1 %v1459_v12, %s2626_s26 }
0x13cb   :  { %2458 = vrcp.f32 %v1568_v20 }
0x13d8   :  { %v2459_v21 = vpop.eup %2458 }
0x1418   :  { %v1574_v22 = vpop.permute.xlu0 %1573 }
0x1419   :  { %v1576_v23 = vmul.f32 %v2459_v21, %v1574_v22 }
0x141b   :  { %1578 = vrot.lane.b32.xlu0 %v1576_v23, %s2626_s26 }
0x143c   :  { %v1462_v24 = vpop.permute.xlu1 %1461 }
0x143d   :  { %v1464_v25 = vadd.f32 %v1462_v24, %v1442_v60 }
0x143f   :  { %2460 = vtanh.f32 %v1464_v25 }
0x144c   :  { %v2461_v26 = vpop.eup %2460 }
0x144d   :  { %v1466_v27 = vsub.f32 %v3032_v41, %v2461_v26 }
0x144f   :  { %1468 = vrot.lane.b32.xlu1 %v1466_v27, %s2633_s29 }
0x148d   :  { %v1579_v53 = vpop.permute.xlu0 %1578 }
0x148e   :  { %v1581_v28 = vadd.f32 %v1579_v53, %v252_v14 }
0x1490   :  { %2462 = vtanh.f32 %v1581_v28 }
0x149d   :  { %v2463_v29 = vpop.eup %2462 }
0x149e   :  { %v1583_v30 = vsub.f32 %v3037_v47, %v2463_v29  ;;  %v2491_v47 = vld [vmem:[#allocation8] sm:$0xff]  }
0x14a0   :  { %1585 = vrot.lane.b32.xlu0 %v1583_v30, %s2633_s29 }
0x14c1   :  { %v1469_v31 = vpop.permute.xlu1 %1468 }
0x14c2   :  { %v1471_v17 = vmul.f32 %v2455_v9, %v1469_v31 }
0x14c4   :  { %1473 = vrot.lane.b32.xlu1 %v1471_v17, %s2634_s30 }
0x1512   :  { %v1586_v18 = vpop.permute.xlu0 %1585 }
0x1513   :  { %v1588_v56 = vmul.f32 %v2459_v21, %v1586_v18 }
0x1515   :  { %1590 = vrot.lane.b32.xlu0 %v1588_v56, %s2634_s30 }
0x1536   :  { %v1474_v33 = vpop.permute.xlu1 %1473 }
0x1537   :  { %v3093_v51 = vadd.f32 %v2461_v26, %v1474_v33 }
0x1539   :  { %v1517_v54 = vpack.c.bf16 %v3093_v51, %v3093_v51 }
0x153b   :  { %1519 = vrot.lane.b32.xlu1 %v1517_v54, %s2626_s26 }
0x1587   :  { %v1591_v34 = vpop.permute.xlu0 %1590 }
0x1588   :  { %v3098_v36 = vadd.f32 %v2463_v29, %v1591_v34 }
0x158a   :  { %v1594_v38 = vpack.c.bf16 %v3098_v36, %v3098_v36 }
0x158c   :  { %1596 = vrot.lane.b32.xlu0 %v1594_v38, %s2626_s26 }
0x15ad   :  { %v1520_v40 = vpop.permute.xlu1 %1519 }
0x15ae   :  { %2312 = vmatmul.mubr.msk.bf16.vlgmr.msra.gmra.mxu0 %vm270_vm2, %v1520_v40  ;;  %v2493_v40 = vld [vmem:[%s3180_s7] ss:$0 sm:$0xff] }
0x15af   :  { %2324 = vmatpush3.bf16.msra.mxu0 %v3046_v49  ;;  %2327 = vmatprep.mubr.msk.bf16.mxu0 %vm2631_vm0, %v2630_v0 }
0x15b0   :  { %2325 = vmatprep.subr.bf16.mxu0 %v2630_v0 }
0x15b3   :  { %2326 = vmatpush3.bf16.msra.mxu0 %v3055_v42 }
0x15b4   :  { %2339 = vmatprep.subr.bf16.mxu0 %v2630_v0 }
0x15fe   :  { %v1597_v41 = vpop.permute.xlu0 %1596 }
0x15ff   :  { %2320 = vmatmul.mubr.msk.bf16.vlgmr.msra.gmra.mxu1 %vm270_vm2, %v1597_v41  ;;  %2328 = vmatmul.mubr.msk.bf16.vlgmr.msra.gmra.mxu0 %vm270_vm2, %v1597_v41 }
0x1600   :  { %2332 = vmatpush3.bf16.msra.mxu1 %v2489_v45  ;;  %2335 = vmatprep.mubr.msk.bf16.mxu1 %vm2631_vm0, %v2630_v0 }
0x1601   :  { %2333 = vmatprep.subr.bf16.mxu1 %v2630_v0  ;;  %2340 = vmatpush3.bf16.msra.mxu0 %v2490_v46 }
0x1602   :  { %2341 = vmatprep.subr.bf16.mxu0 %v2630_v0  ;;  %2343 = vmatprep.mubr.msk.bf16.mxu0 %vm2631_vm0, %v2630_v0 }
0x1604   :  { %2334 = vmatpush3.bf16.msra.mxu1 %v2491_v47 }
0x1605   :  { %2342 = vmatpush3.bf16.msra.mxu0 %v2492_v43  ;;  %2347 = vmatprep.subr.bf16.mxu1 %v2630_v0 }
0x166e   :  { %v1558_v48 = vpop.f32.mrf.mxu0 }
0x166f   :  { %v1648_v49 = vadd.f32 %v1558_v48, %v2804_v44 }
0x1670   :  { %v2313_v42 = vpop.f32.mrf.mxu0 }
0x1671   :  { %1650 = vrot.lane.b32.xlu1 %v1648_v49, %s2626_s26 }
0x1672   :  { %v1561_v50 = vpop.f32.mrf.mxu0 }
0x1674   :  { %v2314_v32 = vpop.f32.mrf.mxu0 }
0x16bf   :  { %v1635_v52 = vpop.f32.mrf.mxu1  ;;  %v1705_v58 = vpop.f32.mrf.mxu0 }
0x16c0   :  { %v1636_v37 = vadd.f32 %v2835_v57, %v1635_v52  ;;  %v1765_v2 = vadd.f32 %v1705_v58, %v2758_v11  ;;  %v255_v11 = vadd.f32 %v3082_v13, %v2828_v55 }
0x16c1   :  { %v2321_v4 = vpop.f32.mrf.mxu1  ;;  %v2329_v59 = vpop.f32.mrf.mxu0 }
0x16c2   :  { %v1641_v60 = vadd.f32 %v1636_v37, %v1558_v48  ;;  %1767 = vrot.lane.b32.xlu0 %v1765_v2, %s2626_s26  ;;  %v1758_v57 = vadd.f32 %v1705_v58, %v255_v11  ;;  %v2384_v4 = vld [vmem:[%s3182_s9 + $0x8] sm:$0xff]   ;;  %v2385_v59 = vld [vmem:[%s3182_s9] sm:$0xff]   ;;  %s2635_s9 = smov [#allocation11]  }
0x16c3   :  { %v1638_v35 = vpop.f32.mrf.mxu1  ;;  %v1708_v61 = vpop.f32.mrf.mxu0 }
0x16c4   :  { %v2046_v62 = vmul.f32 -1.442695, %v1641_v60  ;;  %v2049_v8 = vmul.f32 -1.442695, %v1758_v57 }
0x16c5   :  { %v2322_v63 = vpop.f32.mrf.mxu1  ;;  %v2330_v39 = vpop.f32.mrf.mxu0 }
0x16c6   :  { %2464 = vpow2.f32 %v2046_v62 }
0x16d3   :  { %v2465_v1 = vpop.eup %2464 }
0x16d4   :  { %v1645_v3 = vadd.f32 1.0, %v2465_v1  ;;  %v2052_v1 = vld [vmem:[%s3183_s10] ss:$0 sm:$0xff]  ;;  %s1974_s10 = sshll.u32 %s2635_s9, 4  ;;  %s1975_s10 = int_to_ptr.vmem [resolvable:$true] %s1974_s10 }
0x16d5   :  { %s2574_s6 = scalar_lea.vmem %s1975_s10, 256  ;;  %p2579_p7 = scmp.lt.s32.totalorder %s1975_s10, %s1975_s10 }
0x16d6   :  { %2466 = vrcp.f32 %v1645_v3  ;;  %p2575_p6 = scmp.ne.s32.totalorder %s1975_s10, %s2574_s6  ;;  %p2580_p8 = scmp.lt.s32.totalorder %s2574_s6, %s2574_s6 }
0x16d7   :  { %2468 = vpow2.f32 %v2049_v8 }
0x16d8   :  { %p2581_p9 = por %p2580_p8, %p2579_p7 }
0x16da   :  { %p2582_p10 = pnand %p2581_p9, %p2575_p6 }
0x16e3   :  { %v2467_v5 = vpop.eup %2466  ;;  %v1651_v6 = vpop.permute.xlu1 %1650 }
0x16e4   :  { %v1653_v7 = vmul.f32 %v2467_v5, %v1651_v6  ;;  %v2469_v9 = vpop.eup %2468 }
0x16e5   :  { %v1762_v10 = vadd.f32 1.0, %v2469_v9 }
0x16e6   :  { %1655 = vrot.lane.b32.xlu1 %v1653_v7, %s2626_s26 }
0x16e7   :  { %2470 = vrcp.f32 %v1762_v10 }
0x16f4   :  { %v2471_v12 = vpop.eup %2470 }
0x1734   :  { %v1768_v14 = vpop.permute.xlu0 %1767 }
0x1735   :  { %v1770_v15 = vmul.f32 %v2471_v12, %v1768_v14 }
0x1737   :  { %1772 = vrot.lane.b32.xlu0 %v1770_v15, %s2626_s26 }
0x1758   :  { %v1656_v16 = vpop.permute.xlu1 %1655 }
0x1759   :  { %v1658_v19 = vadd.f32 %v1656_v16, %v1636_v37 }
0x175b   :  { %2472 = vtanh.f32 %v1658_v19 }
0x1768   :  { %v2473_v20 = vpop.eup %2472 }
0x1769   :  { %v1660_v21 = vsub.f32 %v3093_v51, %v2473_v20 }
0x176b   :  { %1662 = vrot.lane.b32.xlu1 %v1660_v21, %s2633_s29 }
0x17a9   :  { %v1773_v55 = vpop.permute.xlu0 %1772 }
0x17aa   :  { %v1775_v13 = vadd.f32 %v1773_v55, %v255_v11 }
0x17ac   :  { %2474 = vtanh.f32 %v1775_v13 }
0x17b9   :  { %v2475_v22 = vpop.eup %2474 }
0x17ba   :  { %v1777_v23 = vsub.f32 %v3098_v36, %v2475_v22 }
0x17bc   :  { %1779 = vrot.lane.b32.xlu0 %v1777_v23, %s2633_s29 }
0x17dd   :  { %v1663_v24 = vpop.permute.xlu1 %1662 }
0x17de   :  { %v1665_v25 = vmul.f32 %v2467_v5, %v1663_v24 }
0x17e0   :  { %1667 = vrot.lane.b32.xlu1 %v1665_v25, %s2634_s30 }
0x182e   :  { %v1780_v26 = vpop.permute.xlu0 %1779 }
0x182f   :  { %v1782_v27 = vmul.f32 %v2471_v12, %v1780_v26 }
0x1831   :  { %1784 = vrot.lane.b32.xlu0 %v1782_v27, %s2634_s30 }
0x1852   :  { %v1668_v53 = vpop.permute.xlu1 %1667 }
0x1853   :  { %v1670_v28 = vadd.f32 %v2473_v20, %v1668_v53 }
0x1855   :  { %v1711_v29 = vpack.c.bf16 %v1670_v28, %v1670_v28 }
0x1857   :  { %1713 = vrot.lane.b32.xlu1 %v1711_v29, %s2626_s26 }
0x18a3   :  { %v1785_v30 = vpop.permute.xlu0 %1784 }
0x18a4   :  { %v1787_v31 = vadd.f32 %v2475_v22, %v1785_v30 }
0x18a6   :  { %v1788_v17 = vpack.c.bf16 %v1787_v31, %v1787_v31 }
0x18a8   :  { %1790 = vrot.lane.b32.xlu0 %v1788_v17, %s2626_s26 }
0x18c9   :  { %v1714_v18 = vpop.permute.xlu1 %1713 }
0x18ca   :  { %2336 = vmatmul.mubr.msk.bf16.vlgmr.msra.gmra.mxu1 %vm270_vm2, %v1714_v18 }
0x18cb   :  { %2351 = vmatprep.mubr.msk.bf16.mxu1 %vm2631_vm0, %v2630_v0  ;;  %2348 = vmatpush3.bf16.msra.mxu1 %v2384_v4 }
0x18cc   :  { %2349 = vmatprep.subr.bf16.mxu1 %v2630_v0 }
0x18cf   :  { %2350 = vmatpush3.bf16.msra.mxu1 %v2385_v59 }
0x191a   :  { %v1791_v56 = vpop.permute.xlu0 %1790 }
0x191b   :  { %2344 = vmatmul.mubr.msk.bf16.vlgmr.msra.gmra.mxu0 %vm270_vm2, %v1791_v56 }
0x198a   :  { %v1752_v33 = vpop.f32.mrf.mxu1 }
0x198b   :  { %v1842_v51 = vadd.f32 %v1752_v33, %v2804_v44 }
0x198c   :  { %v2337_v54 = vpop.f32.mrf.mxu1 }
0x198d   :  { %1844 = vrot.lane.b32.xlu1 %v1842_v51, %s2626_s26 }
0x198e   :  { %v1755_v34 = vpop.f32.mrf.mxu1 }
0x1990   :  { %v2338_v36 = vpop.f32.mrf.mxu1 }
0x19db   :  { %v1829_v38 = vpop.f32.mrf.mxu0 }
0x19dc   :  { %v1830_v41 = vadd.f32 %v2493_v40, %v1829_v38 }
0x19dd   :  { %v2345_v45 = vpop.f32.mrf.mxu0 }
0x19de   :  { %v1835_v46 = vadd.f32 %v1830_v41, %v1752_v33 }
0x19df   :  { %v1832_v47 = vpop.f32.mrf.mxu0 }
0x19e0   :  { %v2051_v43 = vmul.f32 -1.442695, %v1835_v46 }
0x19e1   :  { %v2346_v48 = vpop.f32.mrf.mxu0 }
0x19e2   :  { %2476 = vpow2.f32 %v2051_v43 }
0x19ef   :  { %v2477_v49 = vpop.eup %2476 }
0x19f0   :  { %v1839_v42 = vadd.f32 1.0, %v2477_v49 }
0x19f2   :  { %2478 = vrcp.f32 %v1839_v42 }
0x19ff   :  { %v2479_v44 = vpop.eup %2478  ;;  %v1845_v50 = vpop.permute.xlu1 %1844 }
0x1a00   :  { %v1847_v32 = vmul.f32 %v2479_v44, %v1845_v50 }
0x1a02   :  { %1849 = vrot.lane.b32.xlu0 %v1847_v32, %s2626_s26 }
0x1a74   :  { %v1850_v52 = vpop.permute.xlu0 %1849 }
0x1a75   :  { %v1852_v58 = vadd.f32 %v1850_v52, %v1830_v41 }
0x1a77   :  { %2480 = vtanh.f32 %v1852_v58 }
0x1a84   :  { %v2481_v37 = vpop.eup %2480 }
0x1a85   :  { %v1854_v2 = vsub.f32 %v1670_v28, %v2481_v37 }
0x1a87   :  { %1856 = vrot.lane.b32.xlu1 %v1854_v2, %s2633_s29 }
0x1af9   :  { %v1857_v60 = vpop.permute.xlu1 %1856 }
0x1afa   :  { %v1859_v35 = vmul.f32 %v2479_v44, %v1857_v60 }
0x1afc   :  { %1861 = vrot.lane.b32.xlu0 %v1859_v35, %s2634_s30 }
0x1b6e   :  { %v1862_v61 = vpop.permute.xlu0 %1861 }
0x1b6f   :  { %v1864_v62 = vadd.f32 %v2481_v37, %v1862_v61 }
0x1b71   :  { %v1876_v63 = vpack.c.bf16 %v1864_v62, %v1864_v62 }
0x1b73   :  { %1889 = vrot.lane.b32.xlu1 %v1876_v63, %s2626_s26 }
0x1be5   :  { %v1890_v39 = vpop.permute.xlu1 %1889 }
0x1be6   :  { %2352 = vmatmul.mubr.msk.bf16.vlgmr.msra.gmra.mxu1 %vm270_vm2, %v1890_v39 }
0x1ca6   :  { %v1940_v3 = vpop.f32.mrf.mxu1 }
0x1ca7   :  { %v1941_v0 = vadd.f32 %v2052_v1, %v1940_v3 }
0x1ca8   :  { %v2353_v5 = vpop.f32.mrf.mxu1 }
0x1ca9   :  { %v1947_v6 = vsel %vm1946_vm3, %v1941_v0, -inf }
0x1caa   :  { %1948 = vmax.xlane.f32.xlu0 %v1947_v6  ;;  %v1943_v7 = vpop.f32.mrf.mxu1 }
0x1cac   :  { %v2354_v11 = vpop.f32.mrf.mxu1 }
0x1cc0   :  { %1866 = vrot.lane.b32.xlu0 %v1787_v31, %s2626_s26 }
0x1d33   :  { %v1949_v57 = vpop.xlane.xlu0 %1948 }
0x1d34   :  { %v1950_v8 = vsub.f32 %v1941_v0, %v1949_v57 }
0x1d36   :  { %v1951_v9 = vmul.f32 1.442695, %v1950_v8 }
0x1d37   :  { %v1867_v10 = vpop.permute.xlu0 %1866 }
0x1d38   :  { %2482 = vpow2.f32 %v1951_v9  ;;  %1869 = vst.msk [vmem:[#allocation11] sm:$0xff] %vm270_vm2, %v1867_v10 }
0x1d45   :  { %v2483_v12 = vpop.eup %2482 }
0x1d46   :  { %v1953_v14 = vsel %vm1946_vm3, %v2483_v12, 0.0 }
0x1d47   :  { %1954 = vadd.xlane.f32.xlu1 %v1953_v14 }
0x1d58   :  { %1871 = vrot.lane.b32.xlu1 %v1864_v62, %s2626_s26 }
0x1dd0   :  { %v1955_v15 = vpop.xlane.xlu1 %1954 }
0x1dd1   :  { %2484 = vrcp.f32 %v1955_v15 }
0x1dd4   :  { %v1872_v16 = vpop.permute.xlu1 %1871 }
0x1dd5   :  { %1875 = vst.msk [vmem:[#allocation11 + $0x8] sm:$0xff] %vm270_vm2, %v1872_v16 }
0x1dd6   :  { %2585 = shalt.err (!%p2582_p10)
}
0x1dd7   :  { %s2636_s24 = smov 128   ;;  %s2637_s25 = smov 8  }
0x1dd8   :  { %1980 = dma.vmem_to_hbm [thread:$0]  %s1975_s10, 256, %s3185_s12, [#allocation12], %s2636_s24, %s2636_s24, %s2637_s25  }
0x1dd9   :  { %s2638_s26 = smov [#allocation10]  }
0x1dda   :  { %s1965_s28 = sshll.u32 %s2638_s26, 4  ;;  %s1966_s28 = int_to_ptr.vmem [resolvable:$true] %s1965_s28 }
0x1ddb   :  { %s2594_s29 = scalar_lea.vmem %s1966_s28, 128  ;;  %p2599_p12 = scmp.lt.s32.totalorder %s1966_s28, %s1966_s28 }
0x1ddc   :  { %p2595_p11 = scmp.ne.s32.totalorder %s1966_s28, %s2594_s29  ;;  %p2600_p13 = scmp.lt.s32.totalorder %s2594_s29, %s2594_s29 }
0x1dde   :  { %v2485_v19 = vpop.eup %2484  ;;  %p2601_p0 = por %p2600_p13, %p2599_p12 }
0x1ddf   :  { %v1957_v20 = vmul.f32 %v2485_v19, %v2483_v12 }
0x1de0   :  { %p2602_p1 = pnand %p2601_p0, %p2595_p11 }
0x1de1   :  { %1958 = vst.msk [vmem:[#allocation10] sm:$0xff] %vm1946_vm3, %v1957_v20 }
0x1de2   :  { %2605 = shalt.err (!%p2602_p1)
}
0x1de3   :  { %1968 = dma.vmem_to_hbm [thread:$0]  %s1966_s28, 128, %s3184_s11, [#allocation4]  }
0x1de4   :  { %2620 = dma.done.wait [#allocation4], 128  }
0x1de5   :  { %2621 = vsyncadd [#allocation4], 4294967168 }
0x1de6   :  { %2622 = dma.done.wait [#allocation12], 256  }
0x1de7   :  { %2623 = vsyncadd [#allocation12], 4294967040 }
0x1de8   :  { %1987 = vsyncpa [#allocation3], 1 }
0x1de9   :  { %1988 = vsyncpa [#allocation6], 1 }
0x1dea   :  { %1989 = vsyncpa [#allocation9], 1 }
0x1deb   :  { %1990 = vsyncpa [#allocation4], 1 }
0x1dec   :  { %1991 = vsyncpa [#allocation12], 1 }

</bundles_post_ra>
